<compile_context>
chip_gen: v7x
topology: tpu7x:2x2x1
jax: 0.10.0
libtpu: 0.0.40
codegen_flags: <defaults>
</compile_context>

<pallas_src>
import math

import jax
import jax.numpy as jnp
from jax.experimental import pallas as pl
from jax.experimental.pallas import tpu as pltpu

# ----------------------- small synthetic configuration -----------------------
B = 2             # batch
L = 640           # raw audio samples
CONV = [          # (in_ch, out_ch, kernel, stride) -- scaled-down feature extractor
    (1, 32, 10, 5),
    (32, 32, 4, 4),
]
CONV_DIM = 32
HIDDEN = 64       # hidden_size        (real model: 768)
NUM_HEADS = 2
HEAD_DIM = HIDDEN // NUM_HEADS
FFN = 128
SEG_LAYER = 2     # segmentation_layer (real model: 8) -> encoder layers run
PROJ = 32         # classifier_proj_size (real model: 256)
NUM_LABELS = 16   # num_labels         (real model: 1251)
LN_EPS = 1e-5
NEG_INF = -1e9


def _gelu(x):
    # tanh-approximate GELU (VPU/EUP friendly; cheaper than erf on v5e).
    # TODO(synk): the PyTorch reference uses the exact erf GELU (~1e-3 logit diff).
    return 0.5 * x * (1.0 + jnp.tanh(0.7978845608028654 * (x + 0.044715 * x * x * x)))


def _layer_norm(x, g, b):
    mu = jnp.mean(x, axis=-1, keepdims=True)
    var = jnp.mean((x - mu) ** 2, axis=-1, keepdims=True)
    return (x - mu) * jax.lax.rsqrt(var + LN_EPS) * g + b


# ------------------------------ fused Pallas kernel ---------------------------
def _vghubert_kernel(
        # batch-indexed activations / masks
        sframes_ref, bias_ref, keep_ref,
        # conv feature extractor + feature projection weights (grid-constant)
        w1s_ref, b1s_ref, w2c_ref, b2c_ref, fpg_ref, fpb_ref, fpw_ref, fpb2_ref,
        # per-layer transformer weights (streamed along the layer grid axis)
        wqkv_ref, bqkv_ref, wo_ref, bo_ref, g1_ref, be1_ref,
        w1_ref, b1_ref, w2_ref, b2_ref, g2_ref, be2_ref,
        # classification head weights (grid-constant)
        wp_ref, bp_ref, wc_ref,
        # output + VMEM-resident hidden state
        o_ref, acc_ref):
    """grid = (batch, layer).  One grid step == one transformer layer of one
    sequence.  Conv/feature-projection prologue fused at layer 0, classifier
    head fused at the last layer; the hidden state never leaves VMEM."""
    l = pl.program_id(1)
    nl = pl.num_programs(1)

    # ---- conv feature extractor + feature projection prologue (layer step 0) ----
    @pl.when(l == 0)
    def _():
        sf = sframes_ref[0].astype(jnp.bfloat16)                  # (T_pad, SUP_K)
        # conv1 in "super-frame" form: one matmul whose output columns are already
        # conv2's im2col rows ([k, c] ordering) -> no in-kernel reshape/transpose.
        y1 = _gelu(jnp.dot(sf, w1s_ref[...],
                           preferred_element_type=jnp.float32) + b1s_ref[...])
        y2 = _gelu(jnp.dot(y1.astype(jnp.bfloat16), w2c_ref[...],
                           preferred_element_type=jnp.float32) + b2c_ref[...])
        y2 = _layer_norm(y2, fpg_ref[...], fpb_ref[...])
        acc_ref[...] = jnp.dot(y2.astype(jnp.bfloat16), fpw_ref[...],
                               preferred_element_type=jnp.float32) + fpb2_ref[...]

    # ------------------------- one transformer layer ----------------------------
    x2d = acc_ref[...]                                            # (T_pad, H) f32
    x_bf = x2d.astype(jnp.bfloat16)
    bias = bias_ref[0]                                            # (1, T_pad) additive key mask

    # Q/K/V as three separate dots from a stacked (3, H, H) weight: no mid-tile
    # lane slices of a fused (H, 3H) output.
    q = jnp.dot(x_bf, wqkv_ref[0, 0], preferred_element_type=jnp.float32) + bqkv_ref[0, 0]
    k = jnp.dot(x_bf, wqkv_ref[0, 1], preferred_element_type=jnp.float32) + bqkv_ref[0, 1]
    v = jnp.dot(x_bf, wqkv_ref[0, 2], preferred_element_type=jnp.float32) + bqkv_ref[0, 2]

    scale = 1.0 / math.sqrt(HEAD_DIM)
    ctx_heads = []
    # NOTE: HEAD_DIM=32 < the 128-lane tile at this synthetic width, so a fully
    # lane-aligned head-batched einsum is impossible here; with batch already on
    # the grid this is a 2-step static loop of plain 2-D dots.  At the real
    # H=768 / HEAD_DIM=128 the head offsets are 128-multiples and this becomes
    # one batched einsum (flash-style with sequence tiling).
    for h in range(NUM_HEADS):
        lo = h * HEAD_DIM
        qh = q[:, lo:lo + HEAD_DIM].astype(jnp.bfloat16)
        kh = k[:, lo:lo + HEAD_DIM].astype(jnp.bfloat16)
        vh = v[:, lo:lo + HEAD_DIM].astype(jnp.bfloat16)
        s = jnp.einsum("qd,kd->qk", qh, kh,
                       preferred_element_type=jnp.float32) * scale + bias
        m = jnp.max(s, axis=-1, keepdims=True)
        e = jnp.exp(s - m)
        p = e / jnp.sum(e, axis=-1, keepdims=True)                # exact division
        ctx_heads.append(jnp.dot(p.astype(jnp.bfloat16), vh,
                                 preferred_element_type=jnp.float32))
    ctx = jnp.concatenate(ctx_heads, axis=-1)                     # (T_pad, H)
    # single output projection at K=H (no per-head K=HEAD_DIM accumulation chain)
    attn = jnp.dot(ctx.astype(jnp.bfloat16), wo_ref[0],
                   preferred_element_type=jnp.float32) + bo_ref[0]

    x1 = _layer_norm(x2d + attn, g1_ref[0], be1_ref[0])
    ff = _gelu(jnp.dot(x1.astype(jnp.bfloat16), w1_ref[0],
                       preferred_element_type=jnp.float32) + b1_ref[0])
    ff = jnp.dot(ff.astype(jnp.bfloat16), w2_ref[0],
                 preferred_element_type=jnp.float32) + b2_ref[0]
    acc_ref[...] = _layer_norm(x1 + ff, g2_ref[0], be2_ref[0])

    # ---- classification head fused into the last layer step ----
    @pl.when(l == nl - 1)
    def _():
        hfin = acc_ref[...]                                       # (T_pad, H)
        keep = keep_ref[0]                                        # (1, T_pad); 1.0 = valid frame
        count = jnp.maximum(jnp.sum(keep, axis=-1, keepdims=True), 1.0)
        # masked mean-pool as a (1,T)x(T,H) MXU dot; exact division; denom guarded.
        pooled = jnp.dot(keep, hfin, preferred_element_type=jnp.float32) / count
        proj = jnp.dot(pooled.astype(jnp.bfloat16), wp_ref[...],
                       preferred_element_type=jnp.float32) + bp_ref[...]
        logits = jnp.dot(proj.astype(jnp.bfloat16), wc_ref[...],
                         preferred_element_type=jnp.float32)
        # TODO(synk): at real NUM_LABELS=1251 pad the classifier N to 1280 so the
        # final store is lane-dense, then slice in the wrapper.
        o_ref[...] = logits.reshape(1, 1, -1)


def pallas_vghubert(sframes, attn_bias, keep, conv, stacked, wp_bf, bp, wc_bf):
    bsz, t_pad, sup_k = sframes.shape
    nl = stacked["wqkv"].shape[0]
    h = HIDDEN
    p = wp_bf.shape[1]
    c = wc_bf.shape[1]

    batch3 = lambda b, l: (b, 0, 0)
    const2 = lambda b, l: (0, 0)
    layer3 = lambda b, l: (l, 0, 0)
    layer4 = lambda b, l: (l, 0, 0, 0)

    in_specs = [
        pl.BlockSpec((1, t_pad, sup_k), batch3),      # super-frame im2col of raw audio
        pl.BlockSpec((1, 1, t_pad), batch3),          # additive attention key mask
        pl.BlockSpec((1, 1, t_pad), batch3),          # pooling keep mask (T on lanes)
        pl.BlockSpec(conv["w1s"].shape, const2),      # conv1 super-frame weight (bf16)
        pl.BlockSpec(conv["b1s"].shape, const2),
        pl.BlockSpec(conv["w2c"].shape, const2),      # conv2 im2col weight (bf16)
        pl.BlockSpec(conv["b2c"].shape, const2),
        pl.BlockSpec(conv["fpg"].shape, const2),      # feature-projection LayerNorm
        pl.BlockSpec(conv["fpb"].shape, const2),
        pl.BlockSpec(conv["fpw"].shape, const2),      # feature-projection linear (bf16)
        pl.BlockSpec(conv["fpbias"].shape, const2),
        pl.BlockSpec((1, 3, h, h), layer4),           # wq/wk/wv stacked
        pl.BlockSpec((1, 3, 1, h), layer4),           # bq/bk/bv stacked
        pl.BlockSpec((1, h, h), layer3),              # wo
        pl.BlockSpec((1, 1, h), layer3),              # bo
        pl.BlockSpec((1, 1, h), layer3),              # g1
        pl.BlockSpec((1, 1, h), layer3),              # be1
        pl.BlockSpec((1, h, FFN), layer3),            # w1
        pl.BlockSpec((1, 1, FFN), layer3),            # b1
        pl.BlockSpec((1, FFN, h), layer3),            # w2
        pl.BlockSpec((1, 1, h), layer3),              # b2
        pl.BlockSpec((1, 1, h), layer3),              # g2
        pl.BlockSpec((1, 1, h), layer3),              # be2
        pl.BlockSpec((h, p), const2),                 # projector weight (bf16)
        pl.BlockSpec((1, p), const2),                 # projector bias
        pl.BlockSpec((p, c), const2),                 # classifier weight (bf16, no bias)
    ]
    out = pl.pallas_call(
        _vghubert_kernel,
        out_shape=jax.ShapeDtypeStruct((bsz, 1, c), jnp.float32),
        grid_spec=pltpu.PrefetchScalarGridSpec(
            num_scalar_prefetch=0,
            grid=(bsz, nl),
            in_specs=in_specs,
            out_specs=pl.BlockSpec((1, 1, c), batch3),
            scratch_shapes=[pltpu.VMEM((t_pad, h), jnp.float32)],
        ),
        # Batch axis parallel (2nd TensorCore on v7x); layer axis carries the
        # VMEM-resident hidden state so it must stay "arbitrary".
        # TODO(synk): at real scale (H=768, FFN=3072, 12 layers) set vmem_limit_bytes,
        # keep the resident hidden state in bf16 and tile the sequence (flash-style)
        # to fit v7x's 64 MiB VMEM; default double-buffering on the layer weights.
        compiler_params=pltpu.CompilerParams(
            dimension_semantics=("parallel", "arbitrary")),
    )(sframes, attn_bias, keep,
      conv["w1s"], conv["b1s"], conv["w2c"], conv["b2c"],
      conv["fpg"], conv["fpb"], conv["fpw"], conv["fpbias"],
      stacked["wqkv"], stacked["bqkv"], stacked["wo"], stacked["bo"],
      stacked["g1"], stacked["be1"], stacked["w1"], stacked["b1"],
      stacked["w2"], stacked["b2"], stacked["g2"], stacked["be2"],
      wp_bf, bp.reshape(1, p), wc_bf)
    return out.reshape(bsz, c)


# --------------------------------- glue ---------------------------------------
def _conv_out_len(length):
    for (_, _, k, s) in CONV:
        length = (length - k) // s + 1
    return length


def _conv_weights(params):
    (c1_in, c1_out, k1, s1) = CONV[0]
    (c2_in, c2_out, k2, s2) = CONV[1]
    sup_k = k1 + s1 * (k2 - 1)
    # conv1 weight rearranged block-banded so ONE matmul over 'super-frames' emits
    # conv2's im2col rows directly: w1s[s, k*c1_out + c] = w1[s - s1*k, 0, c].
    w1 = params["conv"][0]["w"][:, 0, :]                           # (k1, c1_out)
    w1s = jnp.zeros((sup_k, k2 * c1_out), jnp.float32)
    for k in range(k2):
        w1s = w1s.at[k * s1:k * s1 + k1, k * c1_out:(k + 1) * c1_out].set(w1)
    return {
        "w1s": w1s.astype(jnp.bfloat16),
        "b1s": jnp.tile(params["conv"][0]["b"], k2)[None, :],
        "w2c": params["conv"][1]["w"].reshape(k2 * c2_in, c2_out).astype(jnp.bfloat16),
        "b2c": params["conv"][1]["b"][None, :],
        "fpg": params["fp_g"][None, :],
        "fpb": params["fp_b"][None, :],
        "fpw": params["fp_w"].astype(jnp.bfloat16),
        "fpbias": params["fp_bias"][None, :],
    }


def _stack_layers(layers):
    def st(name):
        return jnp.stack([lp[name] for lp in layers])
    wqkv = jnp.stack([jnp.stack([lp["wq"], lp["wk"], lp["wv"]])
                      for lp in layers]).astype(jnp.bfloat16)      # (NL, 3, H, H)
    bqkv = jnp.stack([jnp.stack([lp["bq"], lp["bk"], lp["bv"]])
                      for lp in layers])[:, :, None, :]            # (NL, 3, 1, H)
    return {
        "wqkv": wqkv, "bqkv": bqkv,
        "wo": st("wo").astype(jnp.bfloat16), "bo": st("bo")[:, None, :],
        "g1": st("g1")[:, None, :], "be1": st("be1")[:, None, :],
        "w1": st("w1").astype(jnp.bfloat16), "b1": st("b1")[:, None, :],
        "w2": st("w2").astype(jnp.bfloat16), "b2": st("b2")[:, None, :],
        "g2": st("g2")[:, None, :], "be2": st("be2")[:, None, :],
    }


def init_params(key):
    keys = jax.random.split(key, 64)
    it = iter(range(64))

    def nrm(shape):
        return jax.random.normal(keys[next(it)], shape, dtype=jnp.float32) * 0.02

    params = {"conv": [], "layers": []}
    for (cin, cout, k, _) in CONV:
        params["conv"].append({"w": nrm((k, cin, cout)), "b": jnp.zeros((cout,), jnp.float32)})
    params["fp_g"] = jnp.ones((CONV_DIM,), jnp.float32)
    params["fp_b"] = jnp.zeros((CONV_DIM,), jnp.float32)
    params["fp_w"] = nrm((CONV_DIM, HIDDEN))
    params["fp_bias"] = jnp.zeros((HIDDEN,), jnp.float32)
    for _ in range(SEG_LAYER):
        params["layers"].append({
            "wq": nrm((HIDDEN, HIDDEN)), "bq": jnp.zeros((HIDDEN,), jnp.float32),
            "wk": nrm((HIDDEN, HIDDEN)), "bk": jnp.zeros((HIDDEN,), jnp.float32),
            "wv": nrm((HIDDEN, HIDDEN)), "bv": jnp.zeros((HIDDEN,), jnp.float32),
            "wo": nrm((HIDDEN, HIDDEN)), "bo": jnp.zeros((HIDDEN,), jnp.float32),
            "g1": jnp.ones((HIDDEN,), jnp.float32), "be1": jnp.zeros((HIDDEN,), jnp.float32),
            "w1": nrm((HIDDEN, FFN)), "b1": jnp.zeros((FFN,), jnp.float32),
            "w2": nrm((FFN, HIDDEN)), "b2": jnp.zeros((HIDDEN,), jnp.float32),
            "g2": jnp.ones((HIDDEN,), jnp.float32), "be2": jnp.zeros((HIDDEN,), jnp.float32),
        })
    params["proj_w"] = nrm((HIDDEN, PROJ))
    params["proj_b"] = jnp.zeros((PROJ,), jnp.float32)
    params["cls_w"] = nrm((PROJ, NUM_LABELS))       # classifier has no bias
    return params


def vghubert_forward(params, input_values, attention_mask, labels=None):
    bsz, slen = input_values.shape
    padding_mask = jnp.logical_not(attention_mask.astype(bool))          # (B, L)

    # ----- VG-HuBERT base (scaled-down, synthetic weights) -----
    # TODO(synk): the real base model is a checkpointed 12-layer AudioEncoder with a
    # positional-conv embedding; here only `segmentation_layer` synthetic transformer
    # layers are run (tgt_layer semantics), and dropout is identity (eval mode).
    (c1_in, c1_out, k1, s1) = CONV[0]
    (c2_in, c2_out, k2, s2) = CONV[1]
    t1 = (slen - k1) // s1 + 1
    t = (t1 - k2) // s2 + 1                       # real conv-output frame count
    t_pad = ((t + 7) // 8) * 8                    # sublane-padded frame count
    sup_k = k1 + s1 * (k2 - 1)                    # raw samples feeding one conv2 frame
    sup_s = s1 * s2                               # sample stride between conv2 frames

    # super-frame im2col of the raw waveform (gather is glue; one row per conv2 frame)
    # TODO(synk): at real L~160k replace with in-kernel strided loads to avoid the gather.
    need = (t_pad - 1) * sup_s + sup_k
    x_pad = jnp.pad(input_values, ((0, 0), (0, max(0, need - slen))))
    idx = jnp.arange(t_pad)[:, None] * sup_s + jnp.arange(sup_k)[None, :]
    sframes = x_pad[:, idx]                                              # (B, T_pad, SUP_K)

    # additive attention key mask from conv-output lengths (padded frames masked)
    lengths = jnp.sum(attention_mask.astype(jnp.int32), axis=-1)
    feat_len = _conv_out_len(lengths)
    frame_valid = jnp.arange(t_pad)[None, :] < feat_len[:, None]         # (B, T_pad)
    attn_bias = jnp.where(frame_valid, 0.0, NEG_INF).astype(jnp.float32)[:, None, :]

    # ----- classification-head keep mask: exact PyTorch semantics (uses real t) -----
    extra = slen % t
    pm = padding_mask[:, :-extra] if extra > 0 else padding_mask
    pm = pm.reshape(bsz, t, -1)
    frame_pad = jnp.all(pm, axis=-1)                                     # (B, T)
    keep = jnp.logical_not(frame_pad).astype(jnp.float32)
    keep = jnp.pad(keep, ((0, 0), (0, t_pad - t)))[:, None, :]           # (B, 1, T_pad)

    conv = _conv_weights(params)
    stacked = _stack_layers(params["layers"])
    logits = pallas_vghubert(
        sframes, attn_bias, keep, conv, stacked,
        params["proj_w"].astype(jnp.bfloat16), params["proj_b"],
        params["cls_w"].astype(jnp.bfloat16))

    loss = None
    if labels is not None:   # CrossEntropyLoss (mean reduction)
        logp = jax.nn.log_softmax(logits, axis=-1)
        loss = -jnp.mean(jnp.take_along_axis(logp, labels[:, None], axis=-1))
    return loss, logits


if __name__ == "__main__":
    key = jax.random.PRNGKey(0)
    pkey, xkey = jax.random.split(key)
    params = init_params(pkey)

    input_values = jax.random.normal(xkey, (B, L), dtype=jnp.float32)
    sample_lengths = jnp.array([L, 480], dtype=jnp.int32)
    attention_mask = (jnp.arange(L)[None, :] < sample_lengths[:, None]).astype(jnp.int32)
    labels = jnp.array([3, 7], dtype=jnp.int32)

    loss, logits = vghubert_forward(params, input_values, attention_mask, labels)
    (loss, logits) = jax.block_until_ready((loss, logits))
    assert logits.shape == (B, NUM_LABELS)
    assert jnp.isfinite(logits).all() and jnp.isfinite(loss)
    print("KERNEL_OK")
</pallas_src>

<mosaic_0001>
module attributes {stable_mosaic.version = 11 : i64} {
  func.func @_vghubert_kernel(%arg0: i32, %arg1: i32, %arg2: memref<1x32x25xf32, #tpu.memory_space<vmem>>, %arg3: memref<1x1x32xf32, #tpu.memory_space<vmem>>, %arg4: memref<1x1x32xf32, #tpu.memory_space<vmem>>, %arg5: memref<25x128xbf16, #tpu.memory_space<vmem>>, %arg6: memref<1x128xf32, #tpu.memory_space<vmem>>, %arg7: memref<128x32xbf16, #tpu.memory_space<vmem>>, %arg8: memref<1x32xf32, #tpu.memory_space<vmem>>, %arg9: memref<1x32xf32, #tpu.memory_space<vmem>>, %arg10: memref<1x32xf32, #tpu.memory_space<vmem>>, %arg11: memref<32x64xbf16, #tpu.memory_space<vmem>>, %arg12: memref<1x64xf32, #tpu.memory_space<vmem>>, %arg13: memref<1x3x64x64xbf16, #tpu.memory_space<vmem>>, %arg14: memref<1x3x1x64xf32, #tpu.memory_space<vmem>>, %arg15: memref<1x64x64xbf16, #tpu.memory_space<vmem>>, %arg16: memref<1x1x64xf32, #tpu.memory_space<vmem>>, %arg17: memref<1x1x64xf32, #tpu.memory_space<vmem>>, %arg18: memref<1x1x64xf32, #tpu.memory_space<vmem>>, %arg19: memref<1x64x128xbf16, #tpu.memory_space<vmem>>, %arg20: memref<1x1x128xf32, #tpu.memory_space<vmem>>, %arg21: memref<1x128x64xbf16, #tpu.memory_space<vmem>>, %arg22: memref<1x1x64xf32, #tpu.memory_space<vmem>>, %arg23: memref<1x1x64xf32, #tpu.memory_space<vmem>>, %arg24: memref<1x1x64xf32, #tpu.memory_space<vmem>>, %arg25: memref<64x32xbf16, #tpu.memory_space<vmem>>, %arg26: memref<1x32xf32, #tpu.memory_space<vmem>>, %arg27: memref<32x16xbf16, #tpu.memory_space<vmem>>, %arg28: memref<1x1x16xf32, #tpu.memory_space<vmem>>, %arg29: memref<32x64xf32, #tpu.memory_space<vmem>>) attributes {dimension_semantics = [#tpu.dimension_semantics<parallel>, #tpu.dimension_semantics<arbitrary>], iteration_bounds = array<i64: 2, 2>, scalar_prefetch = 0 : i64, scratch_operands = 1 : i64, tpu.core_type = #tpu.core_type<tc>, window_params = [{transform_indices = @transform_0, window_bounds = array<i64: 1, 32, 25>}, {transform_indices = @transform_1, window_bounds = array<i64: 1, 1, 32>}, {transform_indices = @transform_2, window_bounds = array<i64: 1, 1, 32>}, {pipeline_mode = #tpu.pipeline_mode<synchronous>, transform_indices = @transform_3, window_bounds = array<i64: 25, 128>}, {pipeline_mode = #tpu.pipeline_mode<synchronous>, transform_indices = @transform_4, window_bounds = array<i64: 1, 128>}, {pipeline_mode = #tpu.pipeline_mode<synchronous>, transform_indices = @transform_5, window_bounds = array<i64: 128, 32>}, {pipeline_mode = #tpu.pipeline_mode<synchronous>, transform_indices = @transform_6, window_bounds = array<i64: 1, 32>}, {pipeline_mode = #tpu.pipeline_mode<synchronous>, transform_indices = @transform_7, window_bounds = array<i64: 1, 32>}, {pipeline_mode = #tpu.pipeline_mode<synchronous>, transform_indices = @transform_8, window_bounds = array<i64: 1, 32>}, {pipeline_mode = #tpu.pipeline_mode<synchronous>, transform_indices = @transform_9, window_bounds = array<i64: 32, 64>}, {pipeline_mode = #tpu.pipeline_mode<synchronous>, transform_indices = @transform_10, window_bounds = array<i64: 1, 64>}, {transform_indices = @transform_11, window_bounds = array<i64: 1, 3, 64, 64>}, {transform_indices = @transform_12, window_bounds = array<i64: 1, 3, 1, 64>}, {transform_indices = @transform_13, window_bounds = array<i64: 1, 64, 64>}, {transform_indices = @transform_14, window_bounds = array<i64: 1, 1, 64>}, {transform_indices = @transform_15, window_bounds = array<i64: 1, 1, 64>}, {transform_indices = @transform_16, window_bounds = array<i64: 1, 1, 64>}, {transform_indices = @transform_17, window_bounds = array<i64: 1, 64, 128>}, {transform_indices = @transform_18, window_bounds = array<i64: 1, 1, 128>}, {transform_indices = @transform_19, window_bounds = array<i64: 1, 128, 64>}, {transform_indices = @transform_20, window_bounds = array<i64: 1, 1, 64>}, {transform_indices = @transform_21, window_bounds = array<i64: 1, 1, 64>}, {transform_indices = @transform_22, window_bounds = array<i64: 1, 1, 64>}, {pipeline_mode = #tpu.pipeline_mode<synchronous>, transform_indices = @transform_23, window_bounds = array<i64: 64, 32>}, {pipeline_mode = #tpu.pipeline_mode<synchronous>, transform_indices = @transform_24, window_bounds = array<i64: 1, 32>}, {pipeline_mode = #tpu.pipeline_mode<synchronous>, transform_indices = @transform_25, window_bounds = array<i64: 32, 16>}, {transform_indices = @transform_26, window_bounds = array<i64: 1, 1, 16>}]} {
    %c0_i32 = arith.constant 0 : i32
    %0 = arith.cmpi eq, %arg1, %c0_i32 : i32
    %1 = arith.extui %0 : i1 to i32
    %c0_i32_0 = arith.constant 0 : i32
    %2 = arith.cmpi ne, %1, %c0_i32_0 : i32
    scf.if %2 {
      %c0_89 = arith.constant 0 : index
      %c0_90 = arith.constant 0 : index
      %c0_91 = arith.constant 0 : index
      %168 = vector.load %arg2[%c0_89, %c0_90, %c0_91] : memref<1x32x25xf32, #tpu.memory_space<vmem>>, vector<1x32x25xf32>
      %169 = vector.shape_cast %168 : vector<1x32x25xf32> to vector<32x25xf32>
      %170 = arith.truncf %169 : vector<32x25xf32> to vector<32x25xbf16>
      %c0_92 = arith.constant 0 : index
      %c0_93 = arith.constant 0 : index
      %171 = vector.load %arg5[%c0_92, %c0_93] : memref<25x128xbf16, #tpu.memory_space<vmem>>, vector<25x128xbf16>
      %cst_94 = arith.constant dense<0.000000e+00> : vector<32x128xf32>
      %172 = tpu.matmul %170, %171, %cst_94 {dimension_numbers = #tpu.dot_dimension_numbers<[1], [0], [0], [1], [0, 0, 1, 1], [], []>} : vector<32x25xbf16>, vector<25x128xbf16>, vector<32x128xf32> -> vector<32x128xf32>
      %c0_95 = arith.constant 0 : index
      %c0_96 = arith.constant 0 : index
      %173 = vector.load %arg6[%c0_95, %c0_96] : memref<1x128xf32, #tpu.memory_space<vmem>>, vector<1x128xf32>
      %174 = vector.broadcast %173 : vector<1x128xf32> to vector<32x128xf32>
      %175 = arith.addf %172, %174 : vector<32x128xf32>
      %cst_97 = arith.constant 5.000000e-01 : f32
      %176 = vector.broadcast %cst_97 : f32 to vector<32x128xf32>
      %177 = arith.mulf %176, %175 : vector<32x128xf32>
      %cst_98 = arith.constant 4.471500e-02 : f32
      %178 = vector.broadcast %cst_98 : f32 to vector<32x128xf32>
      %179 = arith.mulf %178, %175 : vector<32x128xf32>
      %180 = arith.mulf %179, %175 : vector<32x128xf32>
      %181 = arith.mulf %180, %175 : vector<32x128xf32>
      %182 = arith.addf %175, %181 : vector<32x128xf32>
      %cst_99 = arith.constant 0.797884583 : f32
      %183 = vector.broadcast %cst_99 : f32 to vector<32x128xf32>
      %184 = arith.mulf %183, %182 : vector<32x128xf32>
      %185 = math.tanh %184 : vector<32x128xf32>
      %cst_100 = arith.constant 1.000000e+00 : f32
      %186 = vector.broadcast %cst_100 : f32 to vector<32x128xf32>
      %187 = arith.addf %186, %185 : vector<32x128xf32>
      %188 = arith.mulf %177, %187 : vector<32x128xf32>
      %189 = arith.truncf %188 : vector<32x128xf32> to vector<32x128xbf16>
      %c0_101 = arith.constant 0 : index
      %c0_102 = arith.constant 0 : index
      %190 = vector.load %arg7[%c0_101, %c0_102] : memref<128x32xbf16, #tpu.memory_space<vmem>>, vector<128x32xbf16>
      %cst_103 = arith.constant dense<0.000000e+00> : vector<32x32xf32>
      %191 = tpu.matmul %189, %190, %cst_103 {dimension_numbers = #tpu.dot_dimension_numbers<[1], [0], [0], [1], [0, 0, 1, 1], [], []>} : vector<32x128xbf16>, vector<128x32xbf16>, vector<32x32xf32> -> vector<32x32xf32>
      %c0_104 = arith.constant 0 : index
      %c0_105 = arith.constant 0 : index
      %192 = vector.load %arg8[%c0_104, %c0_105] : memref<1x32xf32, #tpu.memory_space<vmem>>, vector<1x32xf32>
      %193 = vector.broadcast %192 : vector<1x32xf32> to vector<32x32xf32>
      %194 = arith.addf %191, %193 : vector<32x32xf32>
      %cst_106 = arith.constant 5.000000e-01 : f32
      %195 = vector.broadcast %cst_106 : f32 to vector<32x32xf32>
      %196 = arith.mulf %195, %194 : vector<32x32xf32>
      %cst_107 = arith.constant 4.471500e-02 : f32
      %197 = vector.broadcast %cst_107 : f32 to vector<32x32xf32>
      %198 = arith.mulf %197, %194 : vector<32x32xf32>
      %199 = arith.mulf %198, %194 : vector<32x32xf32>
      %200 = arith.mulf %199, %194 : vector<32x32xf32>
      %201 = arith.addf %194, %200 : vector<32x32xf32>
      %cst_108 = arith.constant 0.797884583 : f32
      %202 = vector.broadcast %cst_108 : f32 to vector<32x32xf32>
      %203 = arith.mulf %202, %201 : vector<32x32xf32>
      %204 = math.tanh %203 : vector<32x32xf32>
      %cst_109 = arith.constant 1.000000e+00 : f32
      %205 = vector.broadcast %cst_109 : f32 to vector<32x32xf32>
      %206 = arith.addf %205, %204 : vector<32x32xf32>
      %207 = arith.mulf %196, %206 : vector<32x32xf32>
      %c0_110 = arith.constant 0 : index
      %c0_111 = arith.constant 0 : index
      %208 = vector.load %arg9[%c0_110, %c0_111] : memref<1x32xf32, #tpu.memory_space<vmem>>, vector<1x32xf32>
      %c0_112 = arith.constant 0 : index
      %c0_113 = arith.constant 0 : index
      %209 = vector.load %arg10[%c0_112, %c0_113] : memref<1x32xf32, #tpu.memory_space<vmem>>, vector<1x32xf32>
      %cst_114 = arith.constant dense<0.000000e+00> : vector<32xf32>
      %210 = vector.multi_reduction <add>, %207, %cst_114 [1] : vector<32x32xf32> to vector<32xf32>
      %211 = vector.shape_cast %210 : vector<32xf32> to vector<32x1xf32>
      %cst_115 = arith.constant 3.200000e+01 : f32
      %212 = vector.broadcast %cst_115 : f32 to vector<32x1xf32>
      %213 = arith.divf %211, %212 : vector<32x1xf32>
      %214 = vector.broadcast %213 : vector<32x1xf32> to vector<32x32xf32>
      %215 = arith.subf %207, %214 : vector<32x32xf32>
      %216 = arith.mulf %215, %215 : vector<32x32xf32>
      %cst_116 = arith.constant dense<0.000000e+00> : vector<32xf32>
      %217 = vector.multi_reduction <add>, %216, %cst_116 [1] : vector<32x32xf32> to vector<32xf32>
      %218 = vector.shape_cast %217 : vector<32xf32> to vector<32x1xf32>
      %cst_117 = arith.constant 3.200000e+01 : f32
      %219 = vector.broadcast %cst_117 : f32 to vector<32x1xf32>
      %220 = arith.divf %218, %219 : vector<32x1xf32>
      %221 = vector.broadcast %213 : vector<32x1xf32> to vector<32x32xf32>
      %222 = arith.subf %207, %221 : vector<32x32xf32>
      %cst_118 = arith.constant 9.99999974E-6 : f32
      %223 = vector.broadcast %cst_118 : f32 to vector<32x1xf32>
      %224 = arith.addf %220, %223 : vector<32x1xf32>
      %225 = math.rsqrt %224 : vector<32x1xf32>
      %226 = vector.broadcast %225 : vector<32x1xf32> to vector<32x32xf32>
      %227 = arith.mulf %222, %226 : vector<32x32xf32>
      %228 = vector.broadcast %208 : vector<1x32xf32> to vector<32x32xf32>
      %229 = arith.mulf %227, %228 : vector<32x32xf32>
      %230 = vector.broadcast %209 : vector<1x32xf32> to vector<32x32xf32>
      %231 = arith.addf %229, %230 : vector<32x32xf32>
      %232 = arith.truncf %231 : vector<32x32xf32> to vector<32x32xbf16>
      %c0_119 = arith.constant 0 : index
      %c0_120 = arith.constant 0 : index
      %233 = vector.load %arg11[%c0_119, %c0_120] : memref<32x64xbf16, #tpu.memory_space<vmem>>, vector<32x64xbf16>
      %cst_121 = arith.constant dense<0.000000e+00> : vector<32x64xf32>
      %234 = tpu.matmul %232, %233, %cst_121 {dimension_numbers = #tpu.dot_dimension_numbers<[1], [0], [0], [1], [0, 0, 1, 1], [], []>} : vector<32x32xbf16>, vector<32x64xbf16>, vector<32x64xf32> -> vector<32x64xf32>
      %c0_122 = arith.constant 0 : index
      %c0_123 = arith.constant 0 : index
      %235 = vector.load %arg12[%c0_122, %c0_123] : memref<1x64xf32, #tpu.memory_space<vmem>>, vector<1x64xf32>
      %236 = vector.broadcast %235 : vector<1x64xf32> to vector<32x64xf32>
      %237 = arith.addf %234, %236 : vector<32x64xf32>
      %c0_124 = arith.constant 0 : index
      %c0_125 = arith.constant 0 : index
      %238 = vector.load %arg29[%c0_124, %c0_125] : memref<32x64xf32, #tpu.memory_space<vmem>>, vector<32x64xf32>
      tpu.vector_store %arg29[%c0_124, %c0_125], %237 {strides = array<i32>} : memref<32x64xf32, #tpu.memory_space<vmem>>, vector<32x64xf32>,
    } else {
    }
    %c0 = arith.constant 0 : index
    %c0_1 = arith.constant 0 : index
    %3 = vector.load %arg29[%c0, %c0_1] : memref<32x64xf32, #tpu.memory_space<vmem>>, vector<32x64xf32>
    %4 = arith.truncf %3 : vector<32x64xf32> to vector<32x64xbf16>
    %c0_2 = arith.constant 0 : index
    %c0_3 = arith.constant 0 : index
    %c0_4 = arith.constant 0 : index
    %5 = vector.load %arg3[%c0_2, %c0_3, %c0_4] : memref<1x1x32xf32, #tpu.memory_space<vmem>>, vector<1x1x32xf32>
    %6 = vector.shape_cast %5 : vector<1x1x32xf32> to vector<1x32xf32>
    %c0_5 = arith.constant 0 : index
    %c0_6 = arith.constant 0 : index
    %c0_7 = arith.constant 0 : index
    %c0_8 = arith.constant 0 : index
    %7 = vector.load %arg13[%c0_5, %c0_6, %c0_7, %c0_8] : memref<1x3x64x64xbf16, #tpu.memory_space<vmem>>, vector<1x1x64x64xbf16>
    %8 = vector.shape_cast %7 : vector<1x1x64x64xbf16> to vector<64x64xbf16>
    %cst = arith.constant dense<0.000000e+00> : vector<32x64xf32>
    %9 = tpu.matmul %4, %8, %cst {dimension_numbers = #tpu.dot_dimension_numbers<[1], [0], [0], [1], [0, 0, 1, 1], [], []>} : vector<32x64xbf16>, vector<64x64xbf16>, vector<32x64xf32> -> vector<32x64xf32>
    %c0_9 = arith.constant 0 : index
    %c0_10 = arith.constant 0 : index
    %c0_11 = arith.constant 0 : index
    %c0_12 = arith.constant 0 : index
    %10 = vector.load %arg14[%c0_9, %c0_10, %c0_11, %c0_12] : memref<1x3x1x64xf32, #tpu.memory_space<vmem>>, vector<1x1x1x64xf32>
    %11 = vector.shape_cast %10 : vector<1x1x1x64xf32> to vector<1x64xf32>
    %12 = vector.broadcast %11 : vector<1x64xf32> to vector<32x64xf32>
    %13 = arith.addf %9, %12 : vector<32x64xf32>
    %c0_13 = arith.constant 0 : index
    %c1 = arith.constant 1 : index
    %c0_14 = arith.constant 0 : index
    %c0_15 = arith.constant 0 : index
    %14 = vector.load %arg13[%c0_13, %c1, %c0_14, %c0_15] : memref<1x3x64x64xbf16, #tpu.memory_space<vmem>>, vector<1x1x64x64xbf16>
    %15 = vector.shape_cast %14 : vector<1x1x64x64xbf16> to vector<64x64xbf16>
    %cst_16 = arith.constant dense<0.000000e+00> : vector<32x64xf32>
    %16 = tpu.matmul %4, %15, %cst_16 {dimension_numbers = #tpu.dot_dimension_numbers<[1], [0], [0], [1], [0, 0, 1, 1], [], []>} : vector<32x64xbf16>, vector<64x64xbf16>, vector<32x64xf32> -> vector<32x64xf32>
    %c0_17 = arith.constant 0 : index
    %c1_18 = arith.constant 1 : index
    %c0_19 = arith.constant 0 : index
    %c0_20 = arith.constant 0 : index
    %17 = vector.load %arg14[%c0_17, %c1_18, %c0_19, %c0_20] : memref<1x3x1x64xf32, #tpu.memory_space<vmem>>, vector<1x1x1x64xf32>
    %18 = vector.shape_cast %17 : vector<1x1x1x64xf32> to vector<1x64xf32>
    %19 = vector.broadcast %18 : vector<1x64xf32> to vector<32x64xf32>
    %20 = arith.addf %16, %19 : vector<32x64xf32>
    %c0_21 = arith.constant 0 : index
    %c2 = arith.constant 2 : index
    %c0_22 = arith.constant 0 : index
    %c0_23 = arith.constant 0 : index
    %21 = vector.load %arg13[%c0_21, %c2, %c0_22, %c0_23] : memref<1x3x64x64xbf16, #tpu.memory_space<vmem>>, vector<1x1x64x64xbf16>
    %22 = vector.shape_cast %21 : vector<1x1x64x64xbf16> to vector<64x64xbf16>
    %cst_24 = arith.constant dense<0.000000e+00> : vector<32x64xf32>
    %23 = tpu.matmul %4, %22, %cst_24 {dimension_numbers = #tpu.dot_dimension_numbers<[1], [0], [0], [1], [0, 0, 1, 1], [], []>} : vector<32x64xbf16>, vector<64x64xbf16>, vector<32x64xf32> -> vector<32x64xf32>
    %c0_25 = arith.constant 0 : index
    %c2_26 = arith.constant 2 : index
    %c0_27 = arith.constant 0 : index
    %c0_28 = arith.constant 0 : index
    %24 = vector.load %arg14[%c0_25, %c2_26, %c0_27, %c0_28] : memref<1x3x1x64xf32, #tpu.memory_space<vmem>>, vector<1x1x1x64xf32>
    %25 = vector.shape_cast %24 : vector<1x1x1x64xf32> to vector<1x64xf32>
    %26 = vector.broadcast %25 : vector<1x64xf32> to vector<32x64xf32>
    %27 = arith.addf %23, %26 : vector<32x64xf32>
    %28 = vector.extract_strided_slice %13 {offsets = [0, 0], sizes = [32, 32], strides = [1, 1]} : vector<32x64xf32> to vector<32x32xf32>
    %29 = arith.truncf %28 : vector<32x32xf32> to vector<32x32xbf16>
    %30 = vector.extract_strided_slice %20 {offsets = [0, 0], sizes = [32, 32], strides = [1, 1]} : vector<32x64xf32> to vector<32x32xf32>
    %31 = arith.truncf %30 : vector<32x32xf32> to vector<32x32xbf16>
    %32 = vector.extract_strided_slice %27 {offsets = [0, 0], sizes = [32, 32], strides = [1, 1]} : vector<32x64xf32> to vector<32x32xf32>
    %33 = arith.truncf %32 : vector<32x32xf32> to vector<32x32xbf16>
    "tpu.trace_start"() <{level = 10 : i32, message = "qd,kd->qk"}> : () -> ()
    %cst_29 = arith.constant dense<0.000000e+00> : vector<32x32xf32>
    %34 = tpu.matmul %29, %31, %cst_29 {dimension_numbers = #tpu.dot_dimension_numbers<[1], [1], [0], [0], [0, 0, 1, 0], [], []>} : vector<32x32xbf16>, vector<32x32xbf16>, vector<32x32xf32> -> vector<32x32xf32>
    "tpu.trace_stop"() : () -> ()
    %cst_30 = arith.constant 0.176776692 : f32
    %35 = vector.broadcast %cst_30 : f32 to vector<32x32xf32>
    %36 = arith.mulf %34, %35 : vector<32x32xf32>
    %37 = vector.broadcast %6 : vector<1x32xf32> to vector<32x32xf32>
    %38 = arith.addf %36, %37 : vector<32x32xf32>
    %cst_31 = arith.constant dense<0xFF800000> : vector<32xf32>
    %39 = vector.multi_reduction <maximumf>, %38, %cst_31 [1] : vector<32x32xf32> to vector<32xf32>
    %40 = vector.shape_cast %39 : vector<32xf32> to vector<32x1xf32>
    %41 = vector.broadcast %40 : vector<32x1xf32> to vector<32x32xf32>
    %42 = arith.subf %38, %41 : vector<32x32xf32>
    %43 = math.exp %42 : vector<32x32xf32>
    %cst_32 = arith.constant dense<0.000000e+00> : vector<32xf32>
    %44 = vector.multi_reduction <add>, %43, %cst_32 [1] : vector<32x32xf32> to vector<32xf32>
    %45 = vector.shape_cast %44 : vector<32xf32> to vector<32x1xf32>
    %46 = vector.broadcast %45 : vector<32x1xf32> to vector<32x32xf32>
    %47 = arith.divf %43, %46 : vector<32x32xf32>
    %48 = arith.truncf %47 : vector<32x32xf32> to vector<32x32xbf16>
    %cst_33 = arith.constant dense<0.000000e+00> : vector<32x32xf32>
    %49 = tpu.matmul %48, %33, %cst_33 {dimension_numbers = #tpu.dot_dimension_numbers<[1], [0], [0], [1], [0, 0, 1, 1], [], []>} : vector<32x32xbf16>, vector<32x32xbf16>, vector<32x32xf32> -> vector<32x32xf32>
    %50 = vector.extract_strided_slice %13 {offsets = [0, 32], sizes = [32, 32], strides = [1, 1]} : vector<32x64xf32> to vector<32x32xf32>
    %51 = arith.truncf %50 : vector<32x32xf32> to vector<32x32xbf16>
    %52 = vector.extract_strided_slice %20 {offsets = [0, 32], sizes = [32, 32], strides = [1, 1]} : vector<32x64xf32> to vector<32x32xf32>
    %53 = arith.truncf %52 : vector<32x32xf32> to vector<32x32xbf16>
    %54 = vector.extract_strided_slice %27 {offsets = [0, 32], sizes = [32, 32], strides = [1, 1]} : vector<32x64xf32> to vector<32x32xf32>
    %55 = arith.truncf %54 : vector<32x32xf32> to vector<32x32xbf16>
    "tpu.trace_start"() <{level = 10 : i32, message = "qd,kd->qk"}> : () -> ()
    %cst_34 = arith.constant dense<0.000000e+00> : vector<32x32xf32>
    %56 = tpu.matmul %51, %53, %cst_34 {dimension_numbers = #tpu.dot_dimension_numbers<[1], [1], [0], [0], [0, 0, 1, 0], [], []>} : vector<32x32xbf16>, vector<32x32xbf16>, vector<32x32xf32> -> vector<32x32xf32>
    "tpu.trace_stop"() : () -> ()
    %cst_35 = arith.constant 0.176776692 : f32
    %57 = vector.broadcast %cst_35 : f32 to vector<32x32xf32>
    %58 = arith.mulf %56, %57 : vector<32x32xf32>
    %59 = vector.broadcast %6 : vector<1x32xf32> to vector<32x32xf32>
    %60 = arith.addf %58, %59 : vector<32x32xf32>
    %cst_36 = arith.constant dense<0xFF800000> : vector<32xf32>
    %61 = vector.multi_reduction <maximumf>, %60, %cst_36 [1] : vector<32x32xf32> to vector<32xf32>
    %62 = vector.shape_cast %61 : vector<32xf32> to vector<32x1xf32>
    %63 = vector.broadcast %62 : vector<32x1xf32> to vector<32x32xf32>
    %64 = arith.subf %60, %63 : vector<32x32xf32>
    %65 = math.exp %64 : vector<32x32xf32>
    %cst_37 = arith.constant dense<0.000000e+00> : vector<32xf32>
    %66 = vector.multi_reduction <add>, %65, %cst_37 [1] : vector<32x32xf32> to vector<32xf32>
    %67 = vector.shape_cast %66 : vector<32xf32> to vector<32x1xf32>
    %68 = vector.broadcast %67 : vector<32x1xf32> to vector<32x32xf32>
    %69 = arith.divf %65, %68 : vector<32x32xf32>
    %70 = arith.truncf %69 : vector<32x32xf32> to vector<32x32xbf16>
    %cst_38 = arith.constant dense<0.000000e+00> : vector<32x32xf32>
    %71 = tpu.matmul %70, %55, %cst_38 {dimension_numbers = #tpu.dot_dimension_numbers<[1], [0], [0], [1], [0, 0, 1, 1], [], []>} : vector<32x32xbf16>, vector<32x32xbf16>, vector<32x32xf32> -> vector<32x32xf32>
    %72 = tpu.concatenate %49, %71 in 1 : vector<32x32xf32>, vector<32x32xf32> -> vector<32x64xf32>
    %73 = arith.truncf %72 : vector<32x64xf32> to vector<32x64xbf16>
    %c0_39 = arith.constant 0 : index
    %c0_40 = arith.constant 0 : index
    %c0_41 = arith.constant 0 : index
    %74 = vector.load %arg15[%c0_39, %c0_40, %c0_41] : memref<1x64x64xbf16, #tpu.memory_space<vmem>>, vector<1x64x64xbf16>
    %75 = vector.shape_cast %74 : vector<1x64x64xbf16> to vector<64x64xbf16>
    %cst_42 = arith.constant dense<0.000000e+00> : vector<32x64xf32>
    %76 = tpu.matmul %73, %75, %cst_42 {dimension_numbers = #tpu.dot_dimension_numbers<[1], [0], [0], [1], [0, 0, 1, 1], [], []>} : vector<32x64xbf16>, vector<64x64xbf16>, vector<32x64xf32> -> vector<32x64xf32>
    %c0_43 = arith.constant 0 : index
    %c0_44 = arith.constant 0 : index
    %c0_45 = arith.constant 0 : index
    %77 = vector.load %arg16[%c0_43, %c0_44, %c0_45] : memref<1x1x64xf32, #tpu.memory_space<vmem>>, vector<1x1x64xf32>
    %78 = vector.shape_cast %77 : vector<1x1x64xf32> to vector<1x64xf32>
    %79 = vector.broadcast %78 : vector<1x64xf32> to vector<32x64xf32>
    %80 = arith.addf %76, %79 : vector<32x64xf32>
    %81 = arith.addf %3, %80 : vector<32x64xf32>
    %c0_46 = arith.constant 0 : index
    %c0_47 = arith.constant 0 : index
    %c0_48 = arith.constant 0 : index
    %82 = vector.load %arg17[%c0_46, %c0_47, %c0_48] : memref<1x1x64xf32, #tpu.memory_space<vmem>>, vector<1x1x64xf32>
    %83 = vector.shape_cast %82 : vector<1x1x64xf32> to vector<1x64xf32>
    %c0_49 = arith.constant 0 : index
    %c0_50 = arith.constant 0 : index
    %c0_51 = arith.constant 0 : index
    %84 = vector.load %arg18[%c0_49, %c0_50, %c0_51] : memref<1x1x64xf32, #tpu.memory_space<vmem>>, vector<1x1x64xf32>
    %85 = vector.shape_cast %84 : vector<1x1x64xf32> to vector<1x64xf32>
    %cst_52 = arith.constant dense<0.000000e+00> : vector<32xf32>
    %86 = vector.multi_reduction <add>, %81, %cst_52 [1] : vector<32x64xf32> to vector<32xf32>
    %87 = vector.shape_cast %86 : vector<32xf32> to vector<32x1xf32>
    %cst_53 = arith.constant 6.400000e+01 : f32
    %88 = vector.broadcast %cst_53 : f32 to vector<32x1xf32>
    %89 = arith.divf %87, %88 : vector<32x1xf32>
    %90 = vector.broadcast %89 : vector<32x1xf32> to vector<32x64xf32>
    %91 = arith.subf %81, %90 : vector<32x64xf32>
    %92 = arith.mulf %91, %91 : vector<32x64xf32>
    %cst_54 = arith.constant dense<0.000000e+00> : vector<32xf32>
    %93 = vector.multi_reduction <add>, %92, %cst_54 [1] : vector<32x64xf32> to vector<32xf32>
    %94 = vector.shape_cast %93 : vector<32xf32> to vector<32x1xf32>
    %cst_55 = arith.constant 6.400000e+01 : f32
    %95 = vector.broadcast %cst_55 : f32 to vector<32x1xf32>
    %96 = arith.divf %94, %95 : vector<32x1xf32>
    %97 = vector.broadcast %89 : vector<32x1xf32> to vector<32x64xf32>
    %98 = arith.subf %81, %97 : vector<32x64xf32>
    %cst_56 = arith.constant 9.99999974E-6 : f32
    %99 = vector.broadcast %cst_56 : f32 to vector<32x1xf32>
    %100 = arith.addf %96, %99 : vector<32x1xf32>
    %101 = math.rsqrt %100 : vector<32x1xf32>
    %102 = vector.broadcast %101 : vector<32x1xf32> to vector<32x64xf32>
    %103 = arith.mulf %98, %102 : vector<32x64xf32>
    %104 = vector.broadcast %83 : vector<1x64xf32> to vector<32x64xf32>
    %105 = arith.mulf %103, %104 : vector<32x64xf32>
    %106 = vector.broadcast %85 : vector<1x64xf32> to vector<32x64xf32>
    %107 = arith.addf %105, %106 : vector<32x64xf32>
    %108 = arith.truncf %107 : vector<32x64xf32> to vector<32x64xbf16>
    %c0_57 = arith.constant 0 : index
    %c0_58 = arith.constant 0 : index
    %c0_59 = arith.constant 0 : index
    %109 = vector.load %arg19[%c0_57, %c0_58, %c0_59] : memref<1x64x128xbf16, #tpu.memory_space<vmem>>, vector<1x64x128xbf16>
    %110 = vector.shape_cast %109 : vector<1x64x128xbf16> to vector<64x128xbf16>
    %cst_60 = arith.constant dense<0.000000e+00> : vector<32x128xf32>
    %111 = tpu.matmul %108, %110, %cst_60 {dimension_numbers = #tpu.dot_dimension_numbers<[1], [0], [0], [1], [0, 0, 1, 1], [], []>} : vector<32x64xbf16>, vector<64x128xbf16>, vector<32x128xf32> -> vector<32x128xf32>
    %c0_61 = arith.constant 0 : index
    %c0_62 = arith.constant 0 : index
    %c0_63 = arith.constant 0 : index
    %112 = vector.load %arg20[%c0_61, %c0_62, %c0_63] : memref<1x1x128xf32, #tpu.memory_space<vmem>>, vector<1x1x128xf32>
    %113 = vector.shape_cast %112 : vector<1x1x128xf32> to vector<1x128xf32>
    %114 = vector.broadcast %113 : vector<1x128xf32> to vector<32x128xf32>
    %115 = arith.addf %111, %114 : vector<32x128xf32>
    %cst_64 = arith.constant 5.000000e-01 : f32
    %116 = vector.broadcast %cst_64 : f32 to vector<32x128xf32>
    %117 = arith.mulf %116, %115 : vector<32x128xf32>
    %cst_65 = arith.constant 4.471500e-02 : f32
    %118 = vector.broadcast %cst_65 : f32 to vector<32x128xf32>
    %119 = arith.mulf %118, %115 : vector<32x128xf32>
    %120 = arith.mulf %119, %115 : vector<32x128xf32>
    %121 = arith.mulf %120, %115 : vector<32x128xf32>
    %122 = arith.addf %115, %121 : vector<32x128xf32>
    %cst_66 = arith.constant 0.797884583 : f32
    %123 = vector.broadcast %cst_66 : f32 to vector<32x128xf32>
    %124 = arith.mulf %123, %122 : vector<32x128xf32>
    %125 = math.tanh %124 : vector<32x128xf32>
    %cst_67 = arith.constant 1.000000e+00 : f32
    %126 = vector.broadcast %cst_67 : f32 to vector<32x128xf32>
    %127 = arith.addf %126, %125 : vector<32x128xf32>
    %128 = arith.mulf %117, %127 : vector<32x128xf32>
    %129 = arith.truncf %128 : vector<32x128xf32> to vector<32x128xbf16>
    %c0_68 = arith.constant 0 : index
    %c0_69 = arith.constant 0 : index
    %c0_70 = arith.constant 0 : index
    %130 = vector.load %arg21[%c0_68, %c0_69, %c0_70] : memref<1x128x64xbf16, #tpu.memory_space<vmem>>, vector<1x128x64xbf16>
    %131 = vector.shape_cast %130 : vector<1x128x64xbf16> to vector<128x64xbf16>
    %cst_71 = arith.constant dense<0.000000e+00> : vector<32x64xf32>
    %132 = tpu.matmul %129, %131, %cst_71 {dimension_numbers = #tpu.dot_dimension_numbers<[1], [0], [0], [1], [0, 0, 1, 1], [], []>} : vector<32x128xbf16>, vector<128x64xbf16>, vector<32x64xf32> -> vector<32x64xf32>
    %c0_72 = arith.constant 0 : index
    %c0_73 = arith.constant 0 : index
    %c0_74 = arith.constant 0 : index
    %133 = vector.load %arg22[%c0_72, %c0_73, %c0_74] : memref<1x1x64xf32, #tpu.memory_space<vmem>>, vector<1x1x64xf32>
    %134 = vector.shape_cast %133 : vector<1x1x64xf32> to vector<1x64xf32>
    %135 = vector.broadcast %134 : vector<1x64xf32> to vector<32x64xf32>
    %136 = arith.addf %132, %135 : vector<32x64xf32>
    %137 = arith.addf %107, %136 : vector<32x64xf32>
    %c0_75 = arith.constant 0 : index
    %c0_76 = arith.constant 0 : index
    %c0_77 = arith.constant 0 : index
    %138 = vector.load %arg23[%c0_75, %c0_76, %c0_77] : memref<1x1x64xf32, #tpu.memory_space<vmem>>, vector<1x1x64xf32>
    %139 = vector.shape_cast %138 : vector<1x1x64xf32> to vector<1x64xf32>
    %c0_78 = arith.constant 0 : index
    %c0_79 = arith.constant 0 : index
    %c0_80 = arith.constant 0 : index
    %140 = vector.load %arg24[%c0_78, %c0_79, %c0_80] : memref<1x1x64xf32, #tpu.memory_space<vmem>>, vector<1x1x64xf32>
    %141 = vector.shape_cast %140 : vector<1x1x64xf32> to vector<1x64xf32>
    %cst_81 = arith.constant dense<0.000000e+00> : vector<32xf32>
    %142 = vector.multi_reduction <add>, %137, %cst_81 [1] : vector<32x64xf32> to vector<32xf32>
    %143 = vector.shape_cast %142 : vector<32xf32> to vector<32x1xf32>
    %cst_82 = arith.constant 6.400000e+01 : f32
    %144 = vector.broadcast %cst_82 : f32 to vector<32x1xf32>
    %145 = arith.divf %143, %144 : vector<32x1xf32>
    %146 = vector.broadcast %145 : vector<32x1xf32> to vector<32x64xf32>
    %147 = arith.subf %137, %146 : vector<32x64xf32>
    %148 = arith.mulf %147, %147 : vector<32x64xf32>
    %cst_83 = arith.constant dense<0.000000e+00> : vector<32xf32>
    %149 = vector.multi_reduction <add>, %148, %cst_83 [1] : vector<32x64xf32> to vector<32xf32>
    %150 = vector.shape_cast %149 : vector<32xf32> to vector<32x1xf32>
    %cst_84 = arith.constant 6.400000e+01 : f32
    %151 = vector.broadcast %cst_84 : f32 to vector<32x1xf32>
    %152 = arith.divf %150, %151 : vector<32x1xf32>
    %153 = vector.broadcast %145 : vector<32x1xf32> to vector<32x64xf32>
    %154 = arith.subf %137, %153 : vector<32x64xf32>
    %cst_85 = arith.constant 9.99999974E-6 : f32
    %155 = vector.broadcast %cst_85 : f32 to vector<32x1xf32>
    %156 = arith.addf %152, %155 : vector<32x1xf32>
    %157 = math.rsqrt %156 : vector<32x1xf32>
    %158 = vector.broadcast %157 : vector<32x1xf32> to vector<32x64xf32>
    %159 = arith.mulf %154, %158 : vector<32x64xf32>
    %160 = vector.broadcast %139 : vector<1x64xf32> to vector<32x64xf32>
    %161 = arith.mulf %159, %160 : vector<32x64xf32>
    %162 = vector.broadcast %141 : vector<1x64xf32> to vector<32x64xf32>
    %163 = arith.addf %161, %162 : vector<32x64xf32>
    %c0_86 = arith.constant 0 : index
    %c0_87 = arith.constant 0 : index
    %164 = vector.load %arg29[%c0_86, %c0_87] : memref<32x64xf32, #tpu.memory_space<vmem>>, vector<32x64xf32>
    tpu.vector_store %arg29[%c0_86, %c0_87], %163 {strides = array<i32>} : memref<32x64xf32, #tpu.memory_space<vmem>>, vector<32x64xf32>,
    %c1_i32 = arith.constant 1 : i32
    %165 = arith.cmpi eq, %arg1, %c1_i32 : i32
    %166 = arith.extui %165 : i1 to i32
    %c0_i32_88 = arith.constant 0 : i32
    %167 = arith.cmpi ne, %166, %c0_i32_88 : i32
    scf.if %167 {
      %c0_89 = arith.constant 0 : index
      %c0_90 = arith.constant 0 : index
      %168 = vector.load %arg29[%c0_89, %c0_90] : memref<32x64xf32, #tpu.memory_space<vmem>>, vector<32x64xf32>
      %c0_91 = arith.constant 0 : index
      %c0_92 = arith.constant 0 : index
      %c0_93 = arith.constant 0 : index
      %169 = vector.load %arg4[%c0_91, %c0_92, %c0_93] : memref<1x1x32xf32, #tpu.memory_space<vmem>>, vector<1x1x32xf32>
      %170 = vector.shape_cast %169 : vector<1x1x32xf32> to vector<1x32xf32>
      %cst_94 = arith.constant dense<0.000000e+00> : vector<1xf32>
      %171 = vector.multi_reduction <add>, %170, %cst_94 [1] : vector<1x32xf32> to vector<1xf32>
      %172 = vector.shape_cast %171 : vector<1xf32> to vector<1x1xf32>
      %cst_95 = arith.constant 1.000000e+00 : f32
      %173 = vector.broadcast %cst_95 : f32 to vector<1x1xf32>
      %174 = arith.maximumf %172, %173 : vector<1x1xf32>
      %cst_96 = arith.constant dense<0.000000e+00> : vector<1x64xf32>
      %175 = tpu.matmul %170, %168, %cst_96 {dimension_numbers = #tpu.dot_dimension_numbers<[1], [0], [0], [1], [0, 0, 1, 1], [], []>} : vector<1x32xf32>, vector<32x64xf32>, vector<1x64xf32> -> vector<1x64xf32>
      %176 = vector.broadcast %174 : vector<1x1xf32> to vector<1x64xf32>
      %177 = arith.divf %175, %176 : vector<1x64xf32>
      %178 = arith.truncf %177 : vector<1x64xf32> to vector<1x64xbf16>
      %c0_97 = arith.constant 0 : index
      %c0_98 = arith.constant 0 : index
      %179 = vector.load %arg25[%c0_97, %c0_98] : memref<64x32xbf16, #tpu.memory_space<vmem>>, vector<64x32xbf16>
      %cst_99 = arith.constant dense<0.000000e+00> : vector<1x32xf32>
      %180 = tpu.matmul %178, %179, %cst_99 {dimension_numbers = #tpu.dot_dimension_numbers<[1], [0], [0], [1], [0, 0, 1, 1], [], []>} : vector<1x64xbf16>, vector<64x32xbf16>, vector<1x32xf32> -> vector<1x32xf32>
      %c0_100 = arith.constant 0 : index
      %c0_101 = arith.constant 0 : index
      %181 = vector.load %arg26[%c0_100, %c0_101] : memref<1x32xf32, #tpu.memory_space<vmem>>, vector<1x32xf32>
      %182 = arith.addf %180, %181 : vector<1x32xf32>
      %183 = arith.truncf %182 : vector<1x32xf32> to vector<1x32xbf16>
      %c0_102 = arith.constant 0 : index
      %c0_103 = arith.constant 0 : index
      %184 = vector.load %arg27[%c0_102, %c0_103] : memref<32x16xbf16, #tpu.memory_space<vmem>>, vector<32x16xbf16>
      %cst_104 = arith.constant dense<0.000000e+00> : vector<1x16xf32>
      %185 = tpu.matmul %183, %184, %cst_104 {dimension_numbers = #tpu.dot_dimension_numbers<[1], [0], [0], [1], [0, 0, 1, 1], [], []>} : vector<1x32xbf16>, vector<32x16xbf16>, vector<1x16xf32> -> vector<1x16xf32>
      %186 = vector.shape_cast %185 : vector<1x16xf32> to vector<1x1x16xf32>
      %c0_105 = arith.constant 0 : index
      %c0_106 = arith.constant 0 : index
      %c0_107 = arith.constant 0 : index
      %187 = vector.load %arg28[%c0_105, %c0_106, %c0_107] : memref<1x1x16xf32, #tpu.memory_space<vmem>>, vector<1x1x16xf32>
      tpu.vector_store %arg28[%c0_105, %c0_106, %c0_107], %186 {strides = array<i32>} : memref<1x1x16xf32, #tpu.memory_space<vmem>>, vector<1x1x16xf32>,
    } else {
    }
    return
  }
  func.func @transform_0(%arg0: i32, %arg1: i32) -> (i32, i32, i32) {
    %c0_i32 = arith.constant 0 : i32
    %c0_i32_0 = arith.constant 0 : i32
    %c0_i32_1 = arith.constant 0 : i32
    return %arg0, %c0_i32, %c0_i32_0 : i32, i32, i32
  }
  func.func @transform_1(%arg0: i32, %arg1: i32) -> (i32, i32, i32) {
    %c0_i32 = arith.constant 0 : i32
    %c0_i32_0 = arith.constant 0 : i32
    %c0_i32_1 = arith.constant 0 : i32
    return %arg0, %c0_i32, %c0_i32_0 : i32, i32, i32
  }
  func.func @transform_2(%arg0: i32, %arg1: i32) -> (i32, i32, i32) {
    %c0_i32 = arith.constant 0 : i32
    %c0_i32_0 = arith.constant 0 : i32
    %c0_i32_1 = arith.constant 0 : i32
    return %arg0, %c0_i32, %c0_i32_0 : i32, i32, i32
  }
  func.func @transform_3(%arg0: i32, %arg1: i32) -> (i32, i32) {
    %c0_i32 = arith.constant 0 : i32
    %c0_i32_0 = arith.constant 0 : i32
    %c0_i32_1 = arith.constant 0 : i32
    return %c0_i32, %c0_i32_0 : i32, i32
  }
  func.func @transform_4(%arg0: i32, %arg1: i32) -> (i32, i32) {
    %c0_i32 = arith.constant 0 : i32
    %c0_i32_0 = arith.constant 0 : i32
    %c0_i32_1 = arith.constant 0 : i32
    return %c0_i32, %c0_i32_0 : i32, i32
  }
  func.func @transform_5(%arg0: i32, %arg1: i32) -> (i32, i32) {
    %c0_i32 = arith.constant 0 : i32
    %c0_i32_0 = arith.constant 0 : i32
    %c0_i32_1 = arith.constant 0 : i32
    return %c0_i32, %c0_i32_0 : i32, i32
  }
  func.func @transform_6(%arg0: i32, %arg1: i32) -> (i32, i32) {
    %c0_i32 = arith.constant 0 : i32
    %c0_i32_0 = arith.constant 0 : i32
    %c0_i32_1 = arith.constant 0 : i32
    return %c0_i32, %c0_i32_0 : i32, i32
  }
  func.func @transform_7(%arg0: i32, %arg1: i32) -> (i32, i32) {
    %c0_i32 = arith.constant 0 : i32
    %c0_i32_0 = arith.constant 0 : i32
    %c0_i32_1 = arith.constant 0 : i32
    return %c0_i32, %c0_i32_0 : i32, i32
  }
  func.func @transform_8(%arg0: i32, %arg1: i32) -> (i32, i32) {
    %c0_i32 = arith.constant 0 : i32
    %c0_i32_0 = arith.constant 0 : i32
    %c0_i32_1 = arith.constant 0 : i32
    return %c0_i32, %c0_i32_0 : i32, i32
  }
  func.func @transform_9(%arg0: i32, %arg1: i32) -> (i32, i32) {
    %c0_i32 = arith.constant 0 : i32
    %c0_i32_0 = arith.constant 0 : i32
    %c0_i32_1 = arith.constant 0 : i32
    return %c0_i32, %c0_i32_0 : i32, i32
  }
  func.func @transform_10(%arg0: i32, %arg1: i32) -> (i32, i32) {
    %c0_i32 = arith.constant 0 : i32
    %c0_i32_0 = arith.constant 0 : i32
    %c0_i32_1 = arith.constant 0 : i32
    return %c0_i32, %c0_i32_0 : i32, i32
  }
  func.func @transform_11(%arg0: i32, %arg1: i32) -> (i32, i32, i32, i32) {
    %c0_i32 = arith.constant 0 : i32
    %c0_i32_0 = arith.constant 0 : i32
    %c0_i32_1 = arith.constant 0 : i32
    %c0_i32_2 = arith.constant 0 : i32
    return %arg1, %c0_i32, %c0_i32_0, %c0_i32_1 : i32, i32, i32, i32
  }
  func.func @transform_12(%arg0: i32, %arg1: i32) -> (i32, i32, i32, i32) {
    %c0_i32 = arith.constant 0 : i32
    %c0_i32_0 = arith.constant 0 : i32
    %c0_i32_1 = arith.constant 0 : i32
    %c0_i32_2 = arith.constant 0 : i32
    return %arg1, %c0_i32, %c0_i32_0, %c0_i32_1 : i32, i32, i32, i32
  }
  func.func @transform_13(%arg0: i32, %arg1: i32) -> (i32, i32, i32) {
    %c0_i32 = arith.constant 0 : i32
    %c0_i32_0 = arith.constant 0 : i32
    %c0_i32_1 = arith.constant 0 : i32
    return %arg1, %c0_i32, %c0_i32_0 : i32, i32, i32
  }
  func.func @transform_14(%arg0: i32, %arg1: i32) -> (i32, i32, i32) {
    %c0_i32 = arith.constant 0 : i32
    %c0_i32_0 = arith.constant 0 : i32
    %c0_i32_1 = arith.constant 0 : i32
    return %arg1, %c0_i32, %c0_i32_0 : i32, i32, i32
  }
  func.func @transform_15(%arg0: i32, %arg1: i32) -> (i32, i32, i32) {
    %c0_i32 = arith.constant 0 : i32
    %c0_i32_0 = arith.constant 0 : i32
    %c0_i32_1 = arith.constant 0 : i32
    return %arg1, %c0_i32, %c0_i32_0 : i32, i32, i32
  }
  func.func @transform_16(%arg0: i32, %arg1: i32) -> (i32, i32, i32) {
    %c0_i32 = arith.constant 0 : i32
    %c0_i32_0 = arith.constant 0 : i32
    %c0_i32_1 = arith.constant 0 : i32
    return %arg1, %c0_i32, %c0_i32_0 : i32, i32, i32
  }
  func.func @transform_17(%arg0: i32, %arg1: i32) -> (i32, i32, i32) {
    %c0_i32 = arith.constant 0 : i32
    %c0_i32_0 = arith.constant 0 : i32
    %c0_i32_1 = arith.constant 0 : i32
    return %arg1, %c0_i32, %c0_i32_0 : i32, i32, i32
  }
  func.func @transform_18(%arg0: i32, %arg1: i32) -> (i32, i32, i32) {
    %c0_i32 = arith.constant 0 : i32
    %c0_i32_0 = arith.constant 0 : i32
    %c0_i32_1 = arith.constant 0 : i32
    return %arg1, %c0_i32, %c0_i32_0 : i32, i32, i32
  }
  func.func @transform_19(%arg0: i32, %arg1: i32) -> (i32, i32, i32) {
    %c0_i32 = arith.constant 0 : i32
    %c0_i32_0 = arith.constant 0 : i32
    %c0_i32_1 = arith.constant 0 : i32
    return %arg1, %c0_i32, %c0_i32_0 : i32, i32, i32
  }
  func.func @transform_20(%arg0: i32, %arg1: i32) -> (i32, i32, i32) {
    %c0_i32 = arith.constant 0 : i32
    %c0_i32_0 = arith.constant 0 : i32
    %c0_i32_1 = arith.constant 0 : i32
    return %arg1, %c0_i32, %c0_i32_0 : i32, i32, i32
  }
  func.func @transform_21(%arg0: i32, %arg1: i32) -> (i32, i32, i32) {
    %c0_i32 = arith.constant 0 : i32
    %c0_i32_0 = arith.constant 0 : i32
    %c0_i32_1 = arith.constant 0 : i32
    return %arg1, %c0_i32, %c0_i32_0 : i32, i32, i32
  }
  func.func @transform_22(%arg0: i32, %arg1: i32) -> (i32, i32, i32) {
    %c0_i32 = arith.constant 0 : i32
    %c0_i32_0 = arith.constant 0 : i32
    %c0_i32_1 = arith.constant 0 : i32
    return %arg1, %c0_i32, %c0_i32_0 : i32, i32, i32
  }
  func.func @transform_23(%arg0: i32, %arg1: i32) -> (i32, i32) {
    %c0_i32 = arith.constant 0 : i32
    %c0_i32_0 = arith.constant 0 : i32
    %c0_i32_1 = arith.constant 0 : i32
    return %c0_i32, %c0_i32_0 : i32, i32
  }
  func.func @transform_24(%arg0: i32, %arg1: i32) -> (i32, i32) {
    %c0_i32 = arith.constant 0 : i32
    %c0_i32_0 = arith.constant 0 : i32
    %c0_i32_1 = arith.constant 0 : i32
    return %c0_i32, %c0_i32_0 : i32, i32
  }
  func.func @transform_25(%arg0: i32, %arg1: i32) -> (i32, i32) {
    %c0_i32 = arith.constant 0 : i32
    %c0_i32_0 = arith.constant 0 : i32
    %c0_i32_1 = arith.constant 0 : i32
    return %c0_i32, %c0_i32_0 : i32, i32
  }
  func.func @transform_26(%arg0: i32, %arg1: i32) -> (i32, i32, i32) {
    %c0_i32 = arith.constant 0 : i32
    %c0_i32_0 = arith.constant 0 : i32
    %c0_i32_1 = arith.constant 0 : i32
    return %arg0, %c0_i32, %c0_i32_0 : i32, i32, i32
  }
}

</mosaic_0001>

<bundles_post_ra>
// kernel: tpu_custom_call.1
= control target key start
LH: loop header
LB: loop body
LE: loop exit
PB: predicated region body
PF: predicated region fallthrough
CT: control target
= control target key end

     0   :  { %s5050_s0 = inlined_call_operand.vmem [shape: f32[2,32,25], index: 0, kind: input, shape index: {}]   ;;  %s5051_s1 = inlined_call_operand.vmem [shape: f32[2,1,32], index: 1, kind: input, shape index: {}]   ;;  %s5052_s2 = inlined_call_operand.hbm [shape: f32[2,1,32], index: 2, kind: input, shape index: {}]   ;;  %s5053_s3 = inlined_call_operand.hbm [shape: bf16[25,128], index: 3, kind: input, shape index: {}]   ;;  %s5054_s4 = inlined_call_operand.hbm [shape: f32[1,128], index: 4, kind: input, shape index: {}]   ;;  %s5055_s5 = inlined_call_operand.vmem [shape: bf16[128,32], index: 5, kind: input, shape index: {}]   ;;  %s5056_s6 = inlined_call_operand.hbm [shape: f32[1,32], index: 6, kind: input, shape index: {}]   ;;  %s5057_s7 = inlined_call_operand.hbm [shape: f32[1,32], index: 7, kind: input, shape index: {}]   ;;  %s5058_s8 = inlined_call_operand.hbm [shape: f32[1,32], index: 8, kind: input, shape index: {}]   ;;  %s5059_s9 = inlined_call_operand.vmem [shape: bf16[32,64], index: 9, kind: input, shape index: {}]   ;;  %s5060_s10 = inlined_call_operand.vmem [shape: f32[1,64], index: 10, kind: input, shape index: {}]   ;;  %s5061_s11 = inlined_call_operand.vmem [shape: bf16[2,3,64,64], index: 11, kind: input, shape index: {}]   ;;  %s5062_s12 = inlined_call_operand.vmem [shape: f32[2,3,1,64], index: 12, kind: input, shape index: {}]   ;;  %s5063_s13 = inlined_call_operand.vmem [shape: bf16[2,64,64], index: 13, kind: input, shape index: {}]   ;;  %s5064_s14 = inlined_call_operand.vmem [shape: f32[2,1,64], index: 14, kind: input, shape index: {}]   ;;  %s5065_s15 = inlined_call_operand.vmem [shape: f32[2,1,64], index: 15, kind: input, shape index: {}]   ;;  %s5066_s16 = inlined_call_operand.vmem [shape: f32[2,1,64], index: 16, kind: input, shape index: {}]   ;;  %s5067_s17 = inlined_call_operand.vmem [shape: bf16[2,64,128], index: 17, kind: input, shape index: {}]   ;;  %s5068_s18 = inlined_call_operand.vmem [shape: f32[2,1,128], index: 18, kind: input, shape index: {}]   ;;  %s5069_s19 = inlined_call_operand.vmem [shape: bf16[2,128,64], index: 19, kind: input, shape index: {}]   ;;  %s5070_s20 = inlined_call_operand.vmem [shape: f32[2,1,64], index: 20, kind: input, shape index: {}]   ;;  %s5071_s21 = inlined_call_operand.vmem [shape: f32[2,1,64], index: 21, kind: input, shape index: {}]   ;;  %s5072_s22 = inlined_call_operand.vmem [shape: f32[2,1,64], index: 22, kind: input, shape index: {}]   ;;  %s5073_s23 = inlined_call_operand.vmem [shape: bf16[64,32], index: 23, kind: input, shape index: {}]   ;;  %s5074_s24 = inlined_call_operand.vmem [shape: f32[1,32], index: 24, kind: input, shape index: {}]   ;;  %s5075_s25 = inlined_call_operand.vmem [shape: bf16[32,16], index: 25, kind: input, shape index: {}]   ;;  %s5076_s26 = inlined_call_operand.hbm [shape: f32[2,1,16], index: 26, kind: output, shape index: {}]  }
   0x1   :  { %5110 = sst [smem:[#allocation31_spill]] %s5050_s0 }
   0x2   :  { %5111 = sst [smem:[#allocation32_spill]] %s5051_s1 }
   0x3   :  { %5112 = sst [smem:[#allocation33_spill]] %s5052_s2 }
   0x4   :  { %5113 = sst [smem:[#allocation34_spill]] %s5053_s3 }
   0x5   :  { %5114 = sst [smem:[#allocation35_spill]] %s5054_s4 }
   0x6   :  { %5115 = sst [smem:[#allocation36_spill]] %s5055_s5 }
   0x7   :  { %5116 = sst [smem:[#allocation37_spill]] %s5056_s6 }
   0x8   :  { %5117 = sst [smem:[#allocation38_spill]] %s5057_s7 }
   0x9   :  { %5118 = sst [smem:[#allocation39_spill]] %s5058_s8 }
   0xa   :  { %5119 = sst [smem:[#allocation40_spill]] %s5059_s9 }
   0xb   :  { %5120 = sst [smem:[#allocation41_spill]] %s5060_s10 }
   0xc   :  { %5121 = sst [smem:[#allocation42_spill]] %s5061_s11 }
   0xd   :  { %5122 = sst [smem:[#allocation43_spill]] %s5062_s12 }
   0xe   :  { %5123 = sst [smem:[#allocation44_spill]] %s5063_s13 }
   0xf   :  { %5124 = sst [smem:[#allocation45_spill]] %s5064_s14 }
  0x10   :  { %5125 = sst [smem:[#allocation46_spill]] %s5065_s15 }
  0x11   :  { %5126 = sst [smem:[#allocation47_spill]] %s5066_s16 }
  0x12   :  { %5127 = sst [smem:[#allocation48_spill]] %s5067_s17 }
  0x13   :  { %5128 = sst [smem:[#allocation49_spill]] %s5068_s18 }
  0x14   :  { %5129 = sst [smem:[#allocation50_spill]] %s5069_s19 }
  0x15   :  { %5130 = sst [smem:[#allocation51_spill]] %s5070_s20 }
  0x16   :  { %5131 = sst [smem:[#allocation52_spill]] %s5071_s21 }
  0x17   :  { %5132 = sst [smem:[#allocation53_spill]] %s5072_s22 }
  0x18   :  { %5133 = sst [smem:[#allocation54_spill]] %s5073_s23 }
  0x19   :  { %5134 = sst [smem:[#allocation55_spill]] %s5074_s24 }
  0x1a   :  { %5135 = sst [smem:[#allocation56_spill]] %s5075_s25 }
  0x1b   :  { %5136 = sst [smem:[#allocation57_spill]] %s5076_s26 }
  0x1c   :  { %31 = vsyncpa [#allocation4], 0 }
  0x1d   :  { %33 = vsyncpa [#allocation4 + $0x1], 0 }
  0x1e   :  { %34 = vsyncpa [#allocation7], 0 }
  0x1f   :  { %35 = vsyncpa [#allocation10], 0 }
  0x20   :  { %36 = vsyncpa [#allocation13], 0 }
  0x21   :  { %37 = vsyncpa [#allocation5], 0 }
  0x22   :  { %39 = vsyncpa [#allocation5 + $0x1], 0  ;;  %s4377_s27 = smov 0   ;;  %s4379_s3 = smov 0  }
  0x23   :  { %s4381_s7 = smov 0   ;;  %s4383_s28 = smov 0  }
  0x24   :  { %s4385_s8 = smov 0   ;;  %s4387_s4 = smov 0  }
  0x25   :  { %s4389_s29 = smov 0   ;;  %s4391_s0 = smov 0  }
  0x26 LB: > { %5137 = sst [smem:[#allocation20_spill]] %s4197_s27  ;;  %s5085_s9 = sadd.s32 4294967295, %s4225_s0   ;;  %s4225_s0 = sphi %s4391_s0, %s45_s0   ;;  %s4221_s29 = sphi %s4389_s29, %s5214_s29   ;;  %s4217_s4 = sphi %s4387_s4, %s5213_s4   ;;  %s4213_s8 = sphi %s4385_s8, %s5212_s8   ;;  %s4209_s28 = sphi %s4383_s28, %s5211_s28   ;;  %s4205_s7 = sphi %s4381_s7, %s5210_s7   ;;  %s4201_s3 = sphi %s4379_s3, %s5209_s3   ;;  %s4197_s27 = sphi %s4377_s27, %s5208_s27  }
  0x27   : > { %5138 = sst [smem:[#allocation21_spill]] %s4201_s3  ;;  %p3255_p0 = scmp.ge.s32.totalorder %s4225_s0, 1 }
  0x28   : > { %5139 = sst [smem:[#allocation22_spill]] %s4205_s7  ;;  %p4421_p1 = scmp.eq.s32.totalorder %s5085_s9, 0 }
  0x29   : > { %5140 = sst [smem:[#allocation23_spill]] %s4217_s4  ;;  %p709_p2 = scmp.lt.s32.totalorder %s4225_s0, 5 }
  0x2a   : > { %5141 = sst [smem:[#allocation24_spill]] %s4221_s29  ;;  %s4227_s5 = smov [#allocation6]  }
  0x2b   : > { %5142 = sst [smem:[#allocation25_spill]] %s4225_s0  ;;  %p4426_p3 = pnand %p3255_p0, %p709_p2 }
  0x2c   : > { %s5143_s30 = scalar_select %p4421_p1, 1, 0 }
  0x2d   : > { %s5144_s2 = scalar_select %p4426_p3, 1, 0 }
  0x2e   : > { %s721_s10 = sshll.u32 %s4227_s5, 4  ;;  %p3694_p4 = pneg %p4426_p3  ;;  %s4430_s10 = int_to_ptr.vmem [resolvable:$true] %s721_s10 }
  0x2f   : > { %s4228_s1 = smov [#allocation9]   ;;  %s4229_s26 = smov [#allocation8]  }
  0x30   : > { %p4436_p5 = pnand %p3694_p4, %p4421_p1  ;;  %s749_s9 = sshll.u32 %s4228_s1, 4  ;;  %s4440_s9 = int_to_ptr.vmem [resolvable:$true] %s749_s9 }
  0x31   : > { %s4442_s24 = sshll.u32 %s4229_s26, 4  ;;  %s5146_s5 = sld [smem:[#allocation34_spill]]  ;;  %s736_s24 = int_to_ptr.vmem [resolvable:$true] %s4442_s24 }
  0x32   : > { %p4452_p7 = pneg %p4436_p5 }
  0x37   : > { %s3945_s22 = scalar_lea.hbm %s5146_s5, 256 }
  0x38   : > { %p3946_p6 = scmp.ne.s32.totalorder %s5146_s5, %s3945_s22  ;;  %p3952_p10 = scmp.lt.u32.totalorder %s3945_s22, %s5146_s5 }
  0x3a   : > { %p3948_p8 = pnand %p4452_p7, %p3946_p6 }
  0x3c   : > { %p3949_p9 = pneg %p3948_p8 }
  0x3e   : > { %p3954_p11 = pnand %p3952_p10, %p3949_p9 }
  0x40   : > { %3957 = shalt.err (!%p3954_p11)
}
  0x41   : > { %s3958_s19 = scalar_lea.vmem %s4430_s10, 256  ;;  %p3966_p2 = scmp.lt.s32.totalorder %s4430_s10, %s4430_s10 }
  0x42   : > { %p3959_p12 = scmp.ne.s32.totalorder %s4430_s10, %s3958_s19  ;;  %p3967_p4 = scmp.lt.s32.totalorder %s3958_s19, %s3958_s19 }
  0x44   : > { %p3961_p13 = pnand %p3959_p12, %p4452_p7  ;;  %p3968_p6 = por %p3967_p4, %p3966_p2 }
  0x46   : > { %p3962_p0 = pneg %p3961_p13 }
  0x48   : > { %p3969_p8 = pnand %p3968_p6, %p3962_p0 }
  0x4a   : > { %3972 = shalt.err (!%p3969_p8)
}
  0x4b   : > { %s4230_s21 = smov 64   ;;  %s4231_s22 = smov 4  }
  0x4c   : > { %3697 = dma.hbm_to_vmem [thread:$0]  (!%p4436_p5), %s5146_s5, 256, %s4430_s10, [#allocation7], %s4230_s21, %s4230_s21, %s4231_s22  }
  0x4d   : > { %s5148_s18 = sld [smem:[#allocation37_spill]] }
  0x53   : > { %s3973_s17 = scalar_lea.hbm %s5148_s18, 16 }
  0x54   : > { %p3974_p9 = scmp.ne.s32.totalorder %s5148_s18, %s3973_s17  ;;  %p3980_p12 = scmp.lt.u32.totalorder %s3973_s17, %s5148_s18 }
  0x56   : > { %p3976_p10 = pnand %p3974_p9, %p4452_p7 }
  0x58   : > { %p3977_p11 = pneg %p3976_p10 }
  0x5a   : > { %p3982_p13 = pnand %p3980_p12, %p3977_p11 }
  0x5c   : > { %3985 = shalt.err (!%p3982_p13)
}
  0x5d   : > { %s3986_s10 = scalar_lea.vmem %s4440_s9, 16  ;;  %s3993_s15 = scalar_lea.vmem %s4440_s9, 32 }
  0x5e   : > { %p3987_p0 = scmp.ne.s32.totalorder %s4440_s9, %s3986_s10  ;;  %p3994_p6 = scmp.lt.s32.totalorder %s4440_s9, %s4440_s9 }
  0x5f   : > { %p3995_p8 = scmp.lt.s32.totalorder %s3993_s15, %s3986_s10 }
  0x60   : > { %p3989_p2 = pnand %p3987_p0, %p4452_p7 }
  0x61   : > { %p3996_p9 = por %p3995_p8, %p3994_p6 }
  0x62   : > { %p3990_p4 = pneg %p3989_p2 }
  0x64   : > { %p3997_p10 = pnand %p3996_p9, %p3990_p4 }
  0x66   : > { %4000 = shalt.err (!%p3997_p10)
}
  0x67   : > { %3703 = dma.hbm_to_vmem [thread:$0]  (!%p4436_p5), %s5148_s18, 16, %s4440_s9, [#allocation10]  }
  0x68   : > { %s5149_s22 = sld [smem:[#allocation35_spill]] }
  0x6e   : > { %s4001_s23 = scalar_lea.hbm %s5149_s22, 16 }
  0x6f   : > { %p4002_p11 = scmp.ne.s32.totalorder %s5149_s22, %s4001_s23  ;;  %p4008_p0 = scmp.lt.u32.totalorder %s4001_s23, %s5149_s22 }
  0x71   : > { %p4004_p12 = pnand %p4002_p11, %p4452_p7 }
  0x73   : > { %p4005_p13 = pneg %p4004_p12 }
  0x75   : > { %p4010_p2 = pnand %p4008_p0, %p4005_p13 }
  0x77   : > { %4013 = shalt.err (!%p4010_p2)
}
  0x78   : > { %s4014_s10 = scalar_lea.vmem %s736_s24, 16  ;;  %s4021_s9 = scalar_lea.vmem %s736_s24, 32 }
  0x79   : > { %p4015_p4 = scmp.ne.s32.totalorder %s736_s24, %s4014_s10  ;;  %p4022_p9 = scmp.lt.s32.totalorder %s736_s24, %s736_s24 }
  0x7a   : > { %p4023_p10 = scmp.lt.s32.totalorder %s4021_s9, %s4014_s10 }
  0x7b   : > { %p4017_p6 = pnand %p4015_p4, %p4452_p7 }
  0x7c   : > { %p4024_p3 = por %p4023_p10, %p4022_p9 }
  0x7d   : > { %p4018_p8 = pneg %p4017_p6 }
  0x7f   : > { %p4025_p1 = pnand %p4024_p3, %p4018_p8 }
  0x81   : > { %4028 = shalt.err (!%p4025_p1)
}
  0x82   : > { %3700 = dma.hbm_to_vmem [thread:$0]  (!%p4436_p5), %s5149_s22, 16, %s736_s24, [#allocation7]  }
  0x83   : > { %s4232_s16 = smov [#allocation11]   ;;  %s4233_s21 = smov [#allocation12]  }
  0x84   : > { %s760_s17 = sshll.u32 %s4232_s16, 4  ;;  %s771_s23 = sshll.u32 %s4233_s21, 4  ;;  %s761_s17 = int_to_ptr.vmem [resolvable:$true] %s760_s17  ;;  %s772_s23 = int_to_ptr.vmem [resolvable:$true] %s771_s23 }
  0x85   : > { %s5150_s26 = sld [smem:[#allocation38_spill]] }
  0x8b   : > { %s4029_s19 = scalar_lea.hbm %s5150_s26, 16 }
  0x8c   : > { %p4030_p1 = scmp.ne.s32.totalorder %s5150_s26, %s4029_s19  ;;  %p4036_p12 = scmp.lt.u32.totalorder %s4029_s19, %s5150_s26 }
  0x8e   : > { %p4032_p3 = pnand %p4030_p1, %p4452_p7 }
  0x90   : > { %p4033_p11 = pneg %p4032_p3 }
  0x92   : > { %p4038_p13 = pnand %p4036_p12, %p4033_p11 }
  0x94   : > { %4041 = shalt.err (!%p4038_p13)
}
  0x95   : > { %s4042_s24 = scalar_lea.vmem %s761_s17, 16  ;;  %s4049_s14 = scalar_lea.vmem %s761_s17, 32 }
  0x96   : > { %p4043_p0 = scmp.ne.s32.totalorder %s761_s17, %s4042_s24  ;;  %p4050_p6 = scmp.lt.s32.totalorder %s761_s17, %s761_s17 }
  0x97   : > { %p4051_p8 = scmp.lt.s32.totalorder %s4049_s14, %s4042_s24 }
  0x98   : > { %p4045_p2 = pnand %p4043_p0, %p4452_p7 }
  0x99   : > { %p4052_p9 = por %p4051_p8, %p4050_p6 }
  0x9a   : > { %p4046_p4 = pneg %p4045_p2 }
  0x9c   : > { %p4053_p10 = pnand %p4052_p9, %p4046_p4 }
  0x9e   : > { %4056 = shalt.err (!%p4053_p10)
}
  0x9f   : > { %3706 = dma.hbm_to_vmem [thread:$0]  (!%p4436_p5), %s5150_s26, 16, %s761_s17, [#allocation10]  }
  0xa0   : > { %s5151_s1 = sld [smem:[#allocation39_spill]] }
  0xa6   : > { %s4057_s19 = scalar_lea.hbm %s5151_s1, 16 }
  0xa7   : > { %p4058_p1 = scmp.ne.s32.totalorder %s5151_s1, %s4057_s19  ;;  %p4064_p12 = scmp.lt.u32.totalorder %s4057_s19, %s5151_s1 }
  0xa9   : > { %p4060_p3 = pnand %p4058_p1, %p4452_p7 }
  0xab   : > { %p4061_p11 = pneg %p4060_p3 }
  0xad   : > { %p4066_p13 = pnand %p4064_p12, %p4061_p11 }
  0xaf   : > { %4069 = shalt.err (!%p4066_p13)
}
  0xb0   : > { %s4070_s14 = scalar_lea.vmem %s772_s23, 16  ;;  %s4077_s17 = scalar_lea.vmem %s772_s23, 32 }
  0xb1   : > { %p4071_p0 = scmp.ne.s32.totalorder %s772_s23, %s4070_s14  ;;  %p4078_p6 = scmp.lt.s32.totalorder %s772_s23, %s772_s23 }
  0xb2   : > { %p4079_p8 = scmp.lt.s32.totalorder %s4077_s17, %s4070_s14 }
  0xb3   : > { %p4073_p2 = pnand %p4071_p0, %p4452_p7 }
  0xb4   : > { %p4080_p9 = por %p4079_p8, %p4078_p6 }
  0xb5   : > { %p4074_p4 = pneg %p4073_p2 }
  0xb7   : > { %p4081_p10 = pnand %p4080_p9, %p4074_p4 }
  0xb9   : > { %4084 = shalt.err (!%p4081_p10)
}
  0xba   : > { %3709 = dma.hbm_to_vmem [thread:$0]  (!%p4436_p5), %s5151_s1, 16, %s772_s23, [#allocation13]  }
  0xbb   : > { %s3254_s20 = sadd.s32 4294967294, %s4225_s0   ;;  %s54_s6 = sadd.s32 1, %s4217_s4 }
  0xbc   : > { %p55_p7 = scmp.ge.s32.totalorder %s54_s6, 2  ;;  %s57_s5 = sadd.s32 1, %s4221_s29 }
  0xbd   : > { %s116_s25 = sadd.s32 1, %s4205_s7  ;;  %p123_p1 = scmp.ne.s32.totalorder %s4205_s7, %s4201_s3 }
  0xbe   : > { %s5216_s6 = smov (%p55_p7, %s54_s6), 0  ;;  %s5218_s5 = smov (!%p55_p7, %s57_s5), %s4221_s29 }
  0xbf   : > { %5152 = sst [smem:[#allocation26_spill]] %s5216_s6  ;;  %p124_p3 = scmp.eq.s32.totalorder %s4225_s0, 0 }
  0xc0   : > { %p129_p5 = scmp.ne.s32.totalorder %s4201_s3, %s4197_s27  ;;  %p59_p11 = scmp.ge.s32.totalorder %s5218_s5, 2 }
  0xc1   : > { %s5153_s23 = sadd.s32 4294967295, %s4225_s0   ;;  %p5154_p13 = scmp.ne.s32.totalorder %s5143_s30, 0 }
  0xc2   : > { %p696_p12 = scmp.eq.s32.totalorder %s5153_s23, 3  ;;  %p702_p2 = scmp.eq.s32.totalorder %s3254_s20, 3 }
  0xc3   : > { %p4568_p0 = por %p5154_p13, %p129_p5  ;;  %s5220_s5 = smov (%p59_p11, %s5218_s5), 0 }
  0xc4   : > { %5156 = sst [smem:[#allocation27_spill]] %s5220_s5  ;;  %p4577_p4 = por %p696_p12, %p123_p1 }
  0xc5   : > { %p4581_p6 = por %p702_p2, %p129_p5  ;;  %s113_s15 = ssub.s32 %s4221_s29, %s5220_s5 }
  0xc6   : > { %s5157_s10 = scalar_select %p4577_p4, 1, 0 }
  0xc7   : > { %s5159_s9 = scalar_select %p4581_p6, 1, 0 }
  0xc8   : > { %5158 = sst [smem:[#allocation28_spill]] %s5157_s10  ;;  %p125_p8 = por %p124_p3, %p123_p1 }
  0xc9   : > { %5160 = sst [smem:[#allocation29_spill]] %s5159_s9  ;;  %p114_p9 = scmp.eq.s32.totalorder %s113_s15, 0 }
  0xca   : > { %s811_s24 = sand.u32 1, %s4205_s7   ;;  %p3723_p10 = scmp.lt.s32.totalorder %s4225_s0, 4 }
  0xcb   : > { %s4593_s14 = scalar_select %p114_p9, %s4205_s7, %s116_s25  }
  0xcc   : > { %s3262_s17 = sshll.u32 %s4221_s29, 4  ;;  %s814_s16 = scalar_lea.vmem [#allocation3], %s811_s24 }
  0xcd   : > { %5161 = sst [smem:[#allocation30_spill]] %s4593_s14  ;;  %s821_s21 = sshll.u32 %s814_s16, 4  ;;  %s4601_s21 = int_to_ptr.vmem [resolvable:$true] %s821_s21 }
  0xce   : > { %s5162_s1 = sld [smem:[#allocation33_spill]]  ;;  %p4603_p7 = pnand %p3723_p10, %p125_p8 }
  0xcf   : > { %s812_s25 = scalar_lea.sflag [#allocation4], %s811_s24 }
  0xd0   : > { %p4087_p3 = pneg %p4603_p7 }
  0xd4   : > { %s4599_s18 = scalar_lea.hbm %s5162_s1, %s3262_s17  ;;  %s4090_s20 = scalar_lea.hbm %s5162_s1, 32 }
  0xd5   : > { %s4085_s22 = scalar_lea.hbm %s4599_s18, 16  ;;  %p4091_p12 = scmp.lt.u32.totalorder %s4599_s18, %s5162_s1 }
  0xd6   : > { %p4086_p1 = scmp.ne.s32.totalorder %s4599_s18, %s4085_s22  ;;  %p4092_p13 = scmp.lt.u32.totalorder %s4090_s20, %s4085_s22 }
  0xd7   : > { %p4094_p8 = scmp.lt.u32.totalorder %s4085_s22, %s4599_s18 }
  0xd8   : > { %p4088_p5 = pnand %p4087_p3, %p4086_p1  ;;  %p4093_p2 = por %p4092_p13, %p4091_p12 }
  0xda   : > { %p4089_p11 = pneg %p4088_p5  ;;  %p4095_p9 = por %p4094_p8, %p4093_p2 }
  0xdc   : > { %p4096_p10 = pnand %p4095_p9, %p4089_p11 }
  0xde   : > { %4099 = shalt.err (!%p4096_p10)
}
  0xdf   : > { %s4100_s24 = scalar_lea.vmem %s4601_s21, 16  ;;  %s4234_s17 = smov [#allocation3]  }
  0xe0   : > { %p4101_p1 = scmp.ne.s32.totalorder %s4601_s21, %s4100_s24  ;;  %s4105_s16 = sshll.u32 %s4234_s17, 4  ;;  %s4106_s16 = int_to_ptr.vmem [resolvable:$false] %s4105_s16 }
  0xe1   : > { %s4107_s26 = scalar_lea.vmem %s4106_s16, 32  ;;  %p4108_p4 = scmp.lt.s32.totalorder %s4601_s21, %s4106_s16 }
  0xe2   : > { %p4103_p5 = pnand %p4101_p1, %p4087_p3  ;;  %p4109_p12 = scmp.lt.s32.totalorder %s4107_s26, %s4100_s24 }
  0xe4   : > { %p4104_p6 = pneg %p4103_p5  ;;  %p4110_p13 = por %p4109_p12, %p4108_p4 }
  0xe6   : > { %p4111_p2 = pnand %p4110_p13, %p4104_p6 }
  0xe8   : > { %4114 = shalt.err (!%p4111_p2)
}
  0xe9   : > { %3713 = dma.hbm_to_vmem [thread:$0]  (!%p4603_p7), %s4599_s18, 16, %s4601_s21, %s812_s25  }
  0xea   : > { %p5164_p11 = scmp.ne.s32.totalorder %s5144_s2, 0 }
  0xeb   : > { %s4635_s22 = sand.u32 (!%p5164_p11), 1, %s4201_s3  }
  0xec   : > { %911 = sbr.rel (%p5164_p11) target bundleno = 4577 (0x11e1), region = 124  ;;  %s914_s20 = scalar_lea.sflag (!%p5164_p11), [#allocation4], %s4635_s22 }
  0xf3   : > { %4176 = dma.done.wait (%p4568_p0), %s914_s20, 16  }
  0xf4   : > { %4178 = vsyncadd (%p4568_p0), %s914_s20, 4294967280  ;;  %p5165_p4 = scmp.ne.s32.totalorder %s5143_s30, 0 }
  0xf6   : > { %4180 = dma.done.wait (%p5165_p4), [#allocation7], 272  }
  0xf7   : > { %4182 = vsyncadd (%p5165_p4), [#allocation7], 4294967024 }
  0xf8   : > { %4184 = dma.done.wait (%p5165_p4), [#allocation10], 32  }
  0xf9   : > { %4186 = vsyncadd (%p5165_p4), [#allocation10], 4294967264 }
  0xfa   : > { %4188 = dma.done.wait (%p5165_p4), [#allocation13], 16  }
  0xfb   : > { %4190 = vsyncadd (%p5165_p4), [#allocation13], 4294967280  ;;  %p1056_p0 = scmp.lt.s32.totalorder %s4213_s8, 1  ;;  %p1064_p6 = scmp.lt.s32.totalorder %s4209_s28, 1 }
  0xfc   : > { %s5167_s16 = sld [smem:[#allocation31_spill]]  ;;  %s5168_s11 = sld [smem:[#allocation42_spill]] }
  0xfd   : > { %s4658_s18 = scalar_select %p1056_p0, %s4213_s8, 1 }
  0xfe   : > { %s4661_s2 = scalar_select %p1064_p6, %s4209_s28, 1 }
  0xff   : > { %s3388_s30 = sshll.u32 %s4658_s18, 5  ;;  %s5169_s13 = sld [smem:[#allocation44_spill]] }
 0x100   : > { %s3668_s20 = smul.u32 96, %s4661_s2  ;;  %s3389_s1 = sshll.u32 %s4661_s2, 5 }
 0x101   : > { %s3669_s23 = smul.u32 3, %s4661_s2  ;;  %s5170_s12 = sld [smem:[#allocation43_spill]] }
 0x102   : > { %s4671_s26 = scalar_lea.vmem %s5167_s16, %s3388_s30  ;;  %s4679_s29 = scalar_lea.vmem %s5168_s11, %s3668_s20 }
 0x103   : > { %s5175_s15 = sld [smem:[#allocation49_spill]]  ;;  %s3391_s10 = sshll.u32 %s4661_s2, 6 }
 0x104   : > { %s5176_s16 = sld [smem:[#allocation51_spill]]  ;;  %s5177_s9 = sld [smem:[#allocation50_spill]] }
 0x105   : > { %s4684_s19 = scalar_lea.vmem %s5169_s13, %s3389_s1  ;;  %s5174_s13 = sld [smem:[#allocation48_spill]] }
 0x106   : > { %s5178_s20 = sld [smem:[#allocation52_spill]]  ;;  %s5179_s14 = sld [smem:[#allocation53_spill]] }
 0x107   : > { %s4689_s30 = scalar_lea.vmem %s5170_s12, %s3669_s23  ;;  %s1055_s21 = scalar_lea.vmem [#allocation14], %s4635_s22 }
 0x108   : > { %p3278_p7 = scmp.ne.s32.totalorder %s4209_s28, 0 }
 0x109   : > { %s1094_s12 = scalar_lea.vmem %s5175_s15, %s4661_s2  ;;  %v3807_v0 = vld [vmem:[#allocation6] sm:$0xff] (!%p3278_p7)   ;;  %vm1149_vm0 = vcmask (!%p3278_p7), 1043456   ;;  %v3808_v1 = vld [vmem:[#allocation6 + $0x8] sm:$0x1f] (!%p3278_p7)   ;;  %vm1150_vm1 = vcmask (!%p3278_p7), 1044480   ;;  %vm1142_vm2 = vcmask (!%p3278_p7), 203776  }
 0x10a   : > { %s1102_s25 = scalar_lea.vmem %s5176_s16, %s4661_s2  ;;  %s4720_s6 = scalar_lea.vmem %s5177_s9, %s3391_s10  ;;  %3479 = vmatprep.subr.bf16.mxu0 (!%p3278_p7), %v3807_v0  ;;  %v1114_v2 = vld [vmem:[%s4671_s26] sm:$0xff] (!%p3278_p7)  ;;  %v1115_v3 = vld [vmem:[%s4671_s26 + $0x8] sm:$0xff] (!%p3278_p7)  ;;  %v4235_v4 = vmov (!%p3278_p7), 65535   ;;  %v1116_v7 = vld [vmem:[%s4671_s26 + $0x10] sm:$0xff] (!%p3278_p7)  ;;  %vm1401_vm3 = vcmask (!%p3278_p7), 261120   ;;  %vm1555_vm4 = vcmask (!%p3278_p7), 523264  }
 0x10b   : > { %s4706_s0 = scalar_lea.vmem %s5174_s13, %s3389_s1  ;;  %1113 = sbr.rel (%p3278_p7) target bundleno = 1301 (0x515), region = 152  ;;  %3480 = vmatpush3.bf16.msra.mxu0 (!%p3278_p7), %v3807_v0  ;;  %v1151_v5 = vsel (!%p3278_p7), %vm1149_vm0, 4294967295, %v4235_v4  ;;  %v1118_v6 = vpack.c.bf16 (!%p3278_p7), %v1115_v3, %v1114_v2  ;;  %v1117_v9 = vld [vmem:[%s4671_s26 + $0x18] sm:$0xff] (!%p3278_p7)  ;;  %v3279_v20 = vld [vmem:[#allocation8] ss:$0 sm:$0xff] (!%p3278_p7) }
 0x10c   : > { %s1105_s4 = scalar_lea.vmem %s5178_s20, %s4661_s2  ;;  %s1108_s27 = scalar_lea.vmem %s5179_s14, %s4661_s2  ;;  %v1152_v8 = vsel (!%p3278_p7), %vm1150_vm1, %v1151_v5, 0  ;;  %v1119_v11 = vpack.c.bf16 (!%p3278_p7), %v1117_v9, %v1116_v7  ;;  %v3284_v3 = vld [vmem:[#allocation9] ss:$0 sm:$0xff] (!%p3278_p7) }
 0x10d   : > { %v1154_v10 = vand.u32 (!%p3278_p7), %v3808_v1, %v1152_v8  ;;  %3483 = vmatprep.mubr.msk.bf16.mxu0 (!%p3278_p7), %vm1142_vm2, %v1118_v6  ;;  %s5180_s15 = sld [smem:[#allocation36_spill]] (!%p3278_p7)  ;;  %s5181_s17 = sld [smem:[#allocation40_spill]] (!%p3278_p7) }
 0x10e   : > { %s5182_s9 = sld [smem:[#allocation41_spill]] (!%p3278_p7) }
 0x10f   : > { %3481 = vmatprep.subr.bf16.mxu0 (!%p3278_p7), %v1154_v10 }
 0x110   : > { %3482 = vmatpush3.bf16.msra.mxu0 (!%p3278_p7), %v1154_v10 }
 0x113   : > { %3484 = vmatmul.mubr.msk.bf16.vlgmr.msra.gmra.mrb[0].mxu0 %vm1142_vm2, %v1119_v11  ;;  %v3809_v12 = vld [vmem:[%s5180_s15] sm:$0xff]   ;;  %v3810_v13 = vld [vmem:[%s5180_s15 + $0x8] sm:$0xff]   ;;  %v3811_v14 = vld [vmem:[%s5180_s15 + $0x10] sm:$0xff]  }
 0x114   : > { %3487 = vmatprep.subr.bf16.mxu1 %v3809_v12  ;;  %v3812_v15 = vld [vmem:[%s5180_s15 + $0x18] sm:$0xff]   ;;  %v3813_v16 = vld [vmem:[%s5180_s15 + $0x20] sm:$0xff]   ;;  %v3814_v17 = vld [vmem:[%s5180_s15 + $0x28] sm:$0xff]  }
 0x115   : > { %3488 = vmatpush3.bf16.msra.mxu1 %v3809_v12  ;;  %v3815_v18 = vld [vmem:[%s5180_s15 + $0x30] sm:$0xff]   ;;  %v3816_v19 = vld [vmem:[%s5180_s15 + $0x38] sm:$0xff]  }
 0x116   : > { %3489 = vmatprep.subr.bf16.mxu1 %v3810_v13 }
 0x119   : > { %3490 = vmatpush3.bf16.msra.mxu1 %v3810_v13 }
 0x11a   : > { %3491 = vmatprep.subr.bf16.mxu1 %v3811_v14 }
 0x11d   : > { %3492 = vmatpush3.bf16.msra.mxu1 %v3811_v14 }
 0x11e   : > { %3493 = vmatprep.subr.bf16.mxu1 %v3812_v15 }
 0x121   : > { %3494 = vmatpush3.bf16.msra.mxu1 %v3812_v15 }
 0x122   : > { %3495 = vmatprep.subr.bf16.mxu1 %v3813_v16 }
 0x125   : > { %3496 = vmatpush3.bf16.msra.mxu1 %v3813_v16 }
 0x126   : > { %3497 = vmatprep.subr.bf16.mxu1 %v3814_v17 }
 0x129   : > { %3498 = vmatpush3.bf16.msra.mxu1 %v3814_v17 }
 0x12a   : > { %3499 = vmatprep.subr.bf16.mxu1 %v3815_v18 }
 0x12d   : > { %3500 = vmatpush3.bf16.msra.mxu1 %v3815_v18 }
 0x12e   : > { %3501 = vmatprep.subr.bf16.mxu1 %v3816_v19 }
 0x131   : > { %3502 = vmatpush3.bf16.msra.mxu1 %v3816_v19 }
 0x1e6   : > { %v3485_v21 = vpop.f32.mrb[0].mxu0 }
 0x1e7   : > { %v1199_v22 = vadd.f32 %v3485_v21, %v3279_v20  ;;  %v1190_v23 = vpop.f32.mrb[1].mxu0 }
 0x1e8   : > { %v1191_v24 = vadd.f32 %v3279_v20, %v1190_v23  ;;  %v3486_v25 = vpop.f32.mrb[2].mxu0 }
 0x1e9   : > { %v1211_v26 = vmul.f32 0.044715, %v1199_v22  ;;  %v1202_v27 = vadd.f32 %v3486_v25, %v3279_v20  ;;  %v1193_v28 = vpop.f32.mrb[3].mxu0  ;;  %v1207_v55 = vmul.f32 0.5, %v1199_v22 }
 0x1ea   : > { %v1209_v29 = vmul.f32 0.044715, %v1191_v24  ;;  %v1194_v30 = vadd.f32 %v3279_v20, %v1193_v28  ;;  %v1205_v58 = vmul.f32 0.5, %v1191_v24 }
 0x1eb   : > { %v1215_v31 = vmul.f32 %v1211_v26, %v1199_v22  ;;  %v1212_v32 = vmul.f32 0.044715, %v1202_v27  ;;  %v1208_v56 = vmul.f32 0.5, %v1202_v27 }
 0x1ec   : > { %v1210_v33 = vmul.f32 0.044715, %v1194_v30  ;;  %v1213_v34 = vmul.f32 %v1209_v29, %v1191_v24  ;;  %v1206_v59 = vmul.f32 0.5, %v1194_v30 }
 0x1ed   : > { %v1219_v35 = vmul.f32 %v1215_v31, %v1199_v22  ;;  %v1216_v36 = vmul.f32 %v1212_v32, %v1202_v27 }
 0x1ee   : > { %v1214_v37 = vmul.f32 %v1210_v33, %v1194_v30  ;;  %v1217_v38 = vmul.f32 %v1213_v34, %v1191_v24 }
 0x1ef   : > { %v1220_v39 = vmul.f32 %v1216_v36, %v1202_v27  ;;  %v1223_v40 = vadd.f32 %v1219_v35, %v1199_v22 }
 0x1f0   : > { %v1218_v41 = vmul.f32 %v1214_v37, %v1194_v30  ;;  %v1221_v42 = vadd.f32 %v1217_v38, %v1191_v24 }
 0x1f1   : > { %v1224_v43 = vadd.f32 %v1220_v39, %v1202_v27  ;;  %v1227_v44 = vmul.f32 0.7978846, %v1223_v40 }
 0x1f2   : > { %v1222_v45 = vadd.f32 %v1218_v41, %v1194_v30  ;;  %v1225_v46 = vmul.f32 0.7978846, %v1221_v42 }
 0x1f3   : > { %v1228_v47 = vmul.f32 0.7978846, %v1224_v43  ;;  %3819 = vtanh.f32 %v1227_v44 }
 0x1f4   : > { %v1226_v48 = vmul.f32 0.7978846, %v1222_v45  ;;  %3821 = vtanh.f32 %v1225_v46 }
 0x1f5   : > { %3823 = vtanh.f32 %v1228_v47 }
 0x1f6   : > { %3825 = vtanh.f32 %v1226_v48 }
 0x1fd   : > { %v3820_v49 = vpop.eup %3819 }
 0x1fe   : > { %v3822_v50 = vpop.eup %3821  ;;  %v1235_v51 = vadd.f32 1.0, %v3820_v49 }
 0x1ff   : > { %v3824_v52 = vpop.eup %3823  ;;  %v1233_v53 = vadd.f32 1.0, %v3822_v50 }
 0x200   : > { %v3826_v54 = vpop.eup %3825  ;;  %v1236_v57 = vadd.f32 1.0, %v3824_v52  ;;  %v1239_v61 = vmul.f32 %v1235_v51, %v1207_v55 }
 0x201   : > { %v1234_v60 = vadd.f32 1.0, %v3826_v54  ;;  %v1237_v63 = vmul.f32 %v1233_v53, %v1205_v58 }
 0x202   : > { %v1240_v62 = vmul.f32 %v1236_v57, %v1208_v56 }
 0x203   : > { %v1238_v0 = vmul.f32 %v1234_v60, %v1206_v59 }
 0x204   : > { %v1242_v1 = vpack.c.bf16 %v1240_v62, %v1239_v61 }
 0x205   : > { %v1241_v2 = vpack.c.bf16 %v1238_v0, %v1237_v63 }
 0x207   : > { %3503 = vmatprep.mubr.bf16.mxu1 %v1241_v2 }
 0x208   : > { %3504 = vmatmul.mubr.bf16.vlgmr.msra.gmra.mrb[0].mxu1 %v1242_v1 }
 0x2db   : > { %v3505_v4 = vpop.f32.mrb[0].mxu1 }
 0x2dc   : > { %v1357_v5 = vadd.f32 %v3505_v4, %v3284_v3  ;;  %v1348_v6 = vpop.f32.mrb[1].mxu1 }
 0x2dd   : > { %v1349_v7 = vadd.f32 %v3284_v3, %v1348_v6  ;;  %v3506_v8 = vpop.f32.mrb[2].mxu1 }
 0x2de   : > { %v1369_v9 = vmul.f32 0.044715, %v1357_v5  ;;  %v1360_v10 = vadd.f32 %v3506_v8, %v3284_v3  ;;  %v1351_v11 = vpop.f32.mrb[3].mxu1  ;;  %v1365_v34 = vmul.f32 0.5, %v1357_v5  ;;  %v3817_v8 = vld [vmem:[%s5181_s17] sm:$0xff]  }
 0x2df   : > { %v1367_v12 = vmul.f32 0.044715, %v1349_v7  ;;  %v1352_v13 = vadd.f32 %v3284_v3, %v1351_v11  ;;  %v1363_v37 = vmul.f32 0.5, %v1349_v7  ;;  %3507 = vmatprep.subr.bf16.mxu0 %v3817_v8 }
 0x2e0   : > { %v1370_v14 = vmul.f32 0.044715, %v1360_v10  ;;  %v1373_v15 = vmul.f32 %v1369_v9, %v1357_v5  ;;  %v1366_v41 = vmul.f32 0.5, %v1360_v10  ;;  %3508 = vmatpush3.bf16.msra.mxu0 %v3817_v8  ;;  %v3818_v9 = vld [vmem:[%s5181_s17 + $0x8] sm:$0xff]  }
 0x2e1   : > { %v1368_v16 = vmul.f32 0.044715, %v1352_v13  ;;  %v1371_v17 = vmul.f32 %v1367_v12, %v1349_v7  ;;  %v1364_v44 = vmul.f32 0.5, %v1352_v13  ;;  %3509 = vmatprep.subr.bf16.mxu0 %v3818_v9 }
 0x2e2   : > { %v1377_v18 = vmul.f32 %v1373_v15, %v1357_v5  ;;  %v1374_v19 = vmul.f32 %v1370_v14, %v1360_v10 }
 0x2e3   : > { %v1375_v20 = vmul.f32 %v1371_v17, %v1349_v7  ;;  %v1372_v21 = vmul.f32 %v1368_v16, %v1352_v13 }
 0x2e4   : > { %v1381_v22 = vadd.f32 %v1377_v18, %v1357_v5  ;;  %v1378_v23 = vmul.f32 %v1374_v19, %v1360_v10  ;;  %3510 = vmatpush3.bf16.msra.mxu0 %v3818_v9 }
 0x2e5   : > { %v1379_v24 = vadd.f32 %v1375_v20, %v1349_v7  ;;  %v1376_v25 = vmul.f32 %v1372_v21, %v1352_v13 }
 0x2e6   : > { %v1385_v26 = vmul.f32 0.7978846, %v1381_v22  ;;  %v1382_v27 = vadd.f32 %v1378_v23, %v1360_v10 }
 0x2e7   : > { %v1383_v28 = vmul.f32 0.7978846, %v1379_v24  ;;  %v1380_v29 = vadd.f32 %v1376_v25, %v1352_v13  ;;  %v3293_v24 = vld [vmem:[#allocation11] ss:$0 sm:$0xff] }
 0x2e8   : > { %3827 = vtanh.f32 %v1385_v26  ;;  %v1386_v30 = vmul.f32 0.7978846, %v1382_v27 }
 0x2e9   : > { %3829 = vtanh.f32 %v1383_v28  ;;  %v1384_v31 = vmul.f32 0.7978846, %v1380_v29 }
 0x2ea   : > { %3831 = vtanh.f32 %v1386_v30  ;;  %v3294_v30 = vld [vmem:[#allocation12] ss:$0 sm:$0xff] }
 0x2eb   : > { %3833 = vtanh.f32 %v1384_v31 }
 0x2f2   : > { %v3828_v32 = vpop.eup %3827 }
 0x2f3   : > { %v3830_v33 = vpop.eup %3829  ;;  %v1393_v35 = vadd.f32 1.0, %v3828_v32 }
 0x2f4   : > { %v3832_v36 = vpop.eup %3831  ;;  %v1391_v38 = vadd.f32 1.0, %v3830_v33 }
 0x2f5   : > { %v3834_v39 = vpop.eup %3833  ;;  %v1397_v40 = vmul.f32 %v1393_v35, %v1365_v34  ;;  %v1394_v42 = vadd.f32 1.0, %v3832_v36 }
 0x2f6   : > { %v1395_v43 = vmul.f32 %v1391_v38, %v1363_v37  ;;  %v1392_v45 = vadd.f32 1.0, %v3834_v39 }
 0x2f7   : > { %v1408_v46 = vsel %vm1401_vm3, %v1397_v40, 0.0  ;;  %v1398_v47 = vmul.f32 %v1394_v42, %v1366_v41  ;;  %v3295_v42 = vld [vmem:[%s5182_s9] ss:$0 sm:$0xff] }
 0x2f8   : > { %1409 = vadd.xlane.f32.xlu1 %v1408_v46  ;;  %v1402_v48 = vsel %vm1401_vm3, %v1395_v43, 0.0  ;;  %v1396_v49 = vmul.f32 %v1392_v45, %v1364_v44 }
 0x2f9   : > { %1403 = vadd.xlane.f32.xlu0 %v1402_v48  ;;  %v1411_v50 = vsel %vm1401_vm3, %v1398_v47, 0.0 }
 0x2fa   : > { %v1405_v51 = vsel %vm1401_vm3, %v1396_v49, 0.0 }
 0x2fc   : > { %1412 = vadd.xlane.f32.xlu1 %v1411_v50 }
 0x2fd   : > { %1406 = vadd.xlane.f32.xlu0 %v1405_v51 }
 0x385   : > { %v1410_v52 = vpop.xlane.xlu1 %1409 }
 0x386   : > { %v1417_v53 = vmul.f32 0.03125, %v1410_v52  ;;  %v1404_v54 = vpop.xlane.xlu0 %1403 }
 0x387   : > { %v1415_v55 = vmul.f32 0.03125, %v1404_v54 }
 0x388   : > { %v1421_v56 = vsub.f32 %v1397_v40, %v1417_v53 }
 0x389   : > { %v1419_v57 = vsub.f32 %v1395_v43, %v1415_v55  ;;  %v1413_v58 = vpop.xlane.xlu1 %1412 }
 0x38a   : > { %v1418_v59 = vmul.f32 0.03125, %v1413_v58  ;;  %v1407_v60 = vpop.xlane.xlu0 %1406  ;;  %v1425_v2 = vmul.f32 %v1421_v56, %v1421_v56 }
 0x38b   : > { %v1416_v61 = vmul.f32 0.03125, %v1407_v60  ;;  %v1423_v62 = vmul.f32 %v1419_v57, %v1419_v57 }
 0x38c   : > { %v1422_v63 = vsub.f32 %v1398_v47, %v1418_v59  ;;  %v1433_v4 = vsel %vm1401_vm3, %v1425_v2, 0.0 }
 0x38d   : > { %v1420_v0 = vsub.f32 %v1396_v49, %v1416_v61  ;;  %v1427_v1 = vsel %vm1401_vm3, %v1423_v62, 0.0 }
 0x38e   : > { %1428 = vadd.xlane.f32.xlu0 %v1427_v1  ;;  %v1426_v6 = vmul.f32 %v1422_v63, %v1422_v63 }
 0x38f   : > { %v1424_v3 = vmul.f32 %v1420_v0, %v1420_v0 }
 0x390   : > { %v1436_v7 = vsel %vm1401_vm3, %v1426_v6, 0.0 }
 0x391   : > { %v1430_v5 = vsel %vm1401_vm3, %v1424_v3, 0.0 }
 0x392   : > { %1434 = vadd.xlane.f32.xlu0 %v1433_v4  ;;  %1431 = vadd.xlane.f32.xlu1 %v1430_v5 }
 0x396   : > { %1437 = vadd.xlane.f32.xlu1 %v1436_v7 }
 0x41b   : > { %v1429_v10 = vpop.xlane.xlu0 %1428 }
 0x41c   : > { %v1439_v11 = vmul.f32 0.03125, %v1429_v10 }
 0x41e   : > { %v1443_v12 = vadd.f32 1e-05, %v1439_v11 }
 0x41f   : > { %v1432_v13 = vpop.xlane.xlu1 %1431  ;;  %v1435_v14 = vpop.xlane.xlu0 %1434 }
 0x420   : > { %3835 = vrsqrt.f32 %v1443_v12  ;;  %v1440_v15 = vmul.f32 0.03125, %v1432_v13  ;;  %v1441_v16 = vmul.f32 0.03125, %v1435_v14 }
 0x422   : > { %v1444_v17 = vadd.f32 1e-05, %v1440_v15  ;;  %v1445_v18 = vadd.f32 1e-05, %v1441_v16 }
 0x423   : > { %v1438_v19 = vpop.xlane.xlu1 %1437 }
 0x424   : > { %3837 = vrsqrt.f32 %v1444_v17  ;;  %v1442_v20 = vmul.f32 0.03125, %v1438_v19 }
 0x425   : > { %3839 = vrsqrt.f32 %v1445_v18 }
 0x426   : > { %v1446_v21 = vadd.f32 1e-05, %v1442_v20 }
 0x428   : > { %3841 = vrsqrt.f32 %v1446_v21 }
 0x42a   : > { %v3836_v22 = vpop.eup %3835 }
 0x42b   : > { %v1451_v23 = vmul.f32 %v3836_v22, %v1419_v57 }
 0x42d   : > { %v1461_v28 = vmul.f32 %v3293_v24, %v1451_v23 }
 0x42e   : > { %v3838_v25 = vpop.eup %3837 }
 0x42f   : > { %v3840_v26 = vpop.eup %3839  ;;  %v1452_v27 = vmul.f32 %v3838_v25, %v1420_v0  ;;  %v1471_v35 = vadd.f32 %v3294_v30, %v1461_v28 }
 0x430   : > { %v1453_v29 = vmul.f32 %v3840_v26, %v1421_v56 }
 0x431   : > { %v1462_v31 = vmul.f32 %v3293_v24, %v1452_v27 }
 0x432   : > { %v3842_v32 = vpop.eup %3841  ;;  %v1463_v33 = vmul.f32 %v3293_v24, %v1453_v29 }
 0x433   : > { %v1454_v34 = vmul.f32 %v3842_v32, %v1422_v63  ;;  %v1472_v36 = vadd.f32 %v3294_v30, %v1462_v31 }
 0x434   : > { %v1473_v39 = vadd.f32 %v3294_v30, %v1463_v33 }
 0x435   : > { %v1464_v37 = vmul.f32 %v3293_v24, %v1454_v34  ;;  %v1475_v38 = vpack.c.bf16 %v1472_v36, %v1471_v35 }
 0x437   : > { %3511 = vmatprep.mubr.msk.bf16.mxu0 %vm1401_vm3, %v1475_v38  ;;  %v1474_v40 = vadd.f32 %v3294_v30, %v1464_v37 }
 0x439   : > { %v1476_v41 = vpack.c.bf16 %v1474_v40, %v1473_v39 }
 0x43b   : > { %3512 = vmatmul.mubr.msk.bf16.vlgmr.msra.gmra.mrb[4].mxu0 %vm1401_vm3, %v1476_v41 }
 0x50e   : > { %v3513_v43 = vpop.f32.mrb[4].mxu0 }
 0x50f   : > { %v1549_v44 = vadd.f32 %v3513_v43, %v3295_v42  ;;  %v1540_v45 = vpop.f32.mrb[5].mxu0 }
 0x510   : > { %v1541_v46 = vadd.f32 %v3295_v42, %v1540_v45  ;;  %v3514_v47 = vpop.f32.mrb[6].mxu0 }
 0x511   : > { %1558 = vst.msk [vmem:[#allocation2 + $0x10] sm:$0xff] %vm1555_vm4, %v1549_v44  ;;  %v1552_v48 = vadd.f32 %v3514_v47, %v3295_v42  ;;  %v1543_v49 = vpop.f32.mrb[7].mxu0 }
 0x512   : > { %1556 = vst.msk [vmem:[#allocation2] sm:$0xff] %vm1555_vm4, %v1541_v46  ;;  %v1544_v50 = vadd.f32 %v3295_v42, %v1543_v49 }
 0x513   : > { %1559 = vst.msk [vmem:[#allocation2 + $0x18] sm:$0xff] %vm1555_vm4, %v1552_v48 }
 0x514   : > { %1557 = vst.msk [vmem:[#allocation2 + $0x8] sm:$0xff] %vm1555_vm4, %v1544_v50 }
 0x515 PF: > { %v3853_v51 = vld [vmem:[%s4679_s29] sm:$0xff]   ;;  %v3854_v52 = vld [vmem:[%s4679_s29 + $0x8] sm:$0xff]   ;;  %v3855_v53 = vld [vmem:[%s4679_s29 + $0x10] sm:$0xff]   ;;  %vm1606_vm5 = vcmask 523264   ;;  %vm1848_vm6 = vcmask 261120   ;;  %s4236_s11 = smov 96  }
 0x516   : > { %3515 = vmatprep.subr.bf16.mxu1 %v3853_v51  ;;  %v3856_v57 = vld [vmem:[%s4679_s29 + $0x18] sm:$0xff]   ;;  %v3857_v60 = vld [vmem:[%s4679_s29 + $0x20] sm:$0xff]   ;;  %v3858_v62 = vld [vmem:[%s4679_s29 + $0x28] sm:$0xff]   ;;  %s5183_s13 = sld [smem:[#allocation32_spill]]  ;;  %s5187_s23 = sld [smem:[#allocation46_spill]] }
 0x517   : > { %3516 = vmatpush3.bf16.msra.mxu1 %v3853_v51  ;;  %v3859_v63 = vld [vmem:[%s4679_s29 + $0x30] sm:$0xff]   ;;  %v3860_v0 = vld [vmem:[%s4679_s29 + $0x38] sm:$0xff]   ;;  %v3300_v1 = vld [vmem:[%s4689_s30] ss:$0 sm:$0xff]  ;;  %s5189_s3 = sld [smem:[#allocation47_spill]]  ;;  %p3375_p3 = scmp.ne.s32.totalorder %s4209_s28, 1 }
 0x518   : > { %3517 = vmatprep.subr.bf16.mxu1 %v3854_v52  ;;  %v4791_v58 = vld [vmem:[#allocation2 + $0x10] sm:$0xff]  ;;  %v3316_v13 = vld [vmem:[%s4689_s30 + $0x1] ss:$0 sm:$0xff]  ;;  %v3862_v28 = vld [vmem:[%s4679_s29 + $0x48] sm:$0xff]   ;;  %vm4239_vm7 = vmmov (!%p3375_p3), 0   ;;  %vm2755_vm8 = vcmask (!%p3375_p3), 253952  }
 0x519   : > { %v4782_v54 = vld [vmem:[#allocation2] sm:$0xff]  ;;  %v3863_v31 = vld [vmem:[%s4679_s29 + $0x50] sm:$0xff]   ;;  %v3864_v32 = vld [vmem:[%s4679_s29 + $0x58] sm:$0xff]   ;;  %s5200_s20 = sld [smem:[#allocation55_spill]] (!%p3375_p3)  ;;  %vm2972_vm9 = vcmask (!%p3375_p3), 122880  }
 0x51a   : > { %v4793_v59 = vld [vmem:[#allocation2 + $0x18] sm:$0xff]  ;;  %v3861_v27 = vld [vmem:[%s4679_s29 + $0x40] sm:$0xff]   ;;  %s4237_s29 = smov 32  }
 0x51b   : > { %v4784_v55 = vld [vmem:[#allocation2 + $0x8] sm:$0xff]  ;;  %3518 = vmatpush3.bf16.msra.mxu1 %v3854_v52  ;;  %v4798_v61 = vpack.c.bf16 %v4793_v59, %v4791_v58  ;;  %3539 = vmatprep.subr.bf16.mxu0 %v3861_v27 }
 0x51c   : > { %v1564_v56 = vpack.c.bf16 %v4784_v55, %v4782_v54  ;;  %3519 = vmatprep.subr.bf16.mxu1 %v3855_v53  ;;  %3540 = vmatpush3.bf16.msra.mxu0 %v3861_v27  ;;  %s5184_s1 = scalar_lea.vmem %s5183_s13, %s4658_s18  ;;  %s5188_s24 = scalar_lea.vmem %s5187_s23, %s4661_s2 }
 0x51d   : > { %3541 = vmatprep.subr.bf16.mxu0 %v3862_v28  ;;  %v3341_v37 = vld [vmem:[%s5184_s1] ss:$0 sm:$0xff]  ;;  %s5190_s7 = scalar_lea.vmem %s5189_s3, %s4661_s2 }
 0x51e   : > { %3523 = vmatprep.mubr.msk.bf16.mxu1 %vm1606_vm5, %v1564_v56  ;;  %3547 = vmatprep.mubr.msk.bf16.mxu0 %vm1606_vm5, %v1564_v56 }
 0x51f   : > { %3520 = vmatpush3.bf16.msra.mxu1 %v3855_v53 }
 0x520   : > { %3521 = vmatprep.subr.bf16.mxu1 %v3856_v57  ;;  %3542 = vmatpush3.bf16.msra.mxu0 %v3862_v28 }
 0x521   : > { %3543 = vmatprep.subr.bf16.mxu0 %v3863_v31 }
 0x523   : > { %3522 = vmatpush3.bf16.msra.mxu1 %v3856_v57 }
 0x524   : > { %3527 = vmatprep.subr.bf16.mxu1 %v3857_v60  ;;  %3544 = vmatpush3.bf16.msra.mxu0 %v3863_v31 }
 0x525   : > { %3545 = vmatprep.subr.bf16.mxu0 %v3864_v32 }
 0x526   : > { %3524 = vmatmul.mubr.msk.bf16.vlgmr.msra.gmra.mrb[0].mxu1 %vm1606_vm5, %v4798_v61 }
 0x527   : > { %3528 = vmatpush3.bf16.msra.mxu1 %v3857_v60  ;;  %3535 = vmatprep.mubr.msk.bf16.mxu1 %vm1606_vm5, %v1564_v56 }
 0x528   : > { %3529 = vmatprep.subr.bf16.mxu1 %v3858_v62  ;;  %3546 = vmatpush3.bf16.msra.mxu0 %v3864_v32 }
 0x52b   : > { %3530 = vmatpush3.bf16.msra.mxu1 %v3858_v62  ;;  %3548 = vmatmul.mubr.msk.bf16.vlgmr.msra.gmra.mrb[0].mxu0 %vm1606_vm5, %v4798_v61 }
 0x52c   : > { %3531 = vmatprep.subr.bf16.mxu1 %v3859_v63 }
 0x52f   : > { %3532 = vmatpush3.bf16.msra.mxu1 %v3859_v63 }
 0x530   : > { %3533 = vmatprep.subr.bf16.mxu1 %v3860_v0 }
 0x533   : > { %3534 = vmatpush3.bf16.msra.mxu1 %v3860_v0 }
 0x536   : > { %3536 = vmatmul.mubr.msk.bf16.vlgmr.msra.gmra.mrb[4].mxu1 %vm1606_vm5, %v4798_v61 }
 0x5f9   : > { %v3525_v2 = vpop.f32.mrb[0].mxu1 }
 0x5fa   : > { %v1656_v3 = vadd.f32 %v3525_v2, %v3300_v1  ;;  %v1647_v4 = vpop.f32.mrb[1].mxu1 }
 0x5fb   : > { %v3526_v5 = vpop.f32.mrb[2].mxu1  ;;  %v1648_v8 = vadd.f32 %v3300_v1, %v1647_v4 }
 0x5fc   : > { %v1659_v6 = vadd.f32 %v3526_v5, %v3300_v1  ;;  %v1650_v7 = vpop.f32.mrb[3].mxu1 }
 0x5fd   : > { %v1651_v9 = vadd.f32 %v3300_v1, %v1650_v7 }
 0x5fe   : > { %v1843_v10 = vpack.c.bf16 %v1659_v6, %v1656_v3 }
 0x5ff   : > { %v1842_v11 = vpack.c.bf16 %v1651_v9, %v1648_v8 }
 0x601   : > { %2027 = vrot.lane.b32.xlu1 %v1842_v11, %s4236_s11  ;;  %3555 = vmatprep.mubr.msk.bf16.mxu1 %vm1848_vm6, %v1842_v11 }
 0x605   : > { %2029 = vrot.lane.b32.xlu1 %v1843_v10, %s4236_s11 }
 0x609   : > { %v3537_v12 = vpop.f32.mrb[4].mxu1 }
 0x60a   : > { %v1737_v14 = vpop.f32.mrb[5].mxu1  ;;  %v1746_v16 = vadd.f32 %v3537_v12, %v3316_v13 }
 0x60b   : > { %v3538_v15 = vpop.f32.mrb[6].mxu1  ;;  %v1738_v19 = vadd.f32 %v3316_v13, %v1737_v14 }
 0x60c   : > { %v1749_v17 = vadd.f32 %v3538_v15, %v3316_v13  ;;  %v1740_v18 = vpop.f32.mrb[7].mxu1 }
 0x60d   : > { %v1741_v20 = vadd.f32 %v3316_v13, %v1740_v18 }
 0x60e   : > { %v1845_v21 = vpack.c.bf16 %v1749_v17, %v1746_v16 }
 0x60f   : > { %v1844_v22 = vpack.c.bf16 %v1741_v20, %v1738_v19  ;;  %v3549_v20 = vpop.f32.mrb[0].mxu0 }
 0x610   : > { %v1859_v24 = vsel %vm1848_vm6, %v1845_v21, 0 }
 0x611   : > { %2033 = vrot.lane.b32.xlu0 %v1844_v22, %s4236_s11  ;;  %3664 = vmatprep.subr.msk.bf16.mxu1 %vm1848_vm6, %v1844_v22  ;;  %v1856_v23 = vsel %vm1848_vm6, %v1844_v22, 0 }
 0x612   : > { %3552 = vmatpush3.bf16.xpose.msra.mxu1 %v1856_v23  ;;  %v1827_v23 = vpop.f32.mrb[1].mxu0 }
 0x613   : > { %3665 = vmatprep.subr.msk.bf16.mxu1 %vm1848_vm6, %v1845_v21 }
 0x615   : > { %2035 = vrot.lane.b32.xlu0 %v1845_v21, %s4236_s11  ;;  %v3332_v21 = vld [vmem:[%s4689_s30 + $0x2] ss:$0 sm:$0xff]  ;;  %s5185_s30 = sld [smem:[#allocation45_spill]] }
 0x616   : > { %v1836_v22 = vadd.f32 %v3549_v20, %v3332_v21 }
 0x61a   : > { %3554 = vmatpush3.bf16.xpose.msra.mxu1 %v1859_v24  ;;  %v3550_v24 = vpop.f32.mrb[2].mxu0 }
 0x61b   : > { %s5186_s14 = scalar_lea.vmem %s5185_s30, %s4661_s2 }
 0x621   : > { %3556 = vmatmul.mubr.msk.bf16.vlgmr.msra.gmra.mrb[8].mxu1 %vm1848_vm6, %v1843_v10 }
 0x673   : > { %v2028_v25 = vpop.permute.xlu1 %2027 }
 0x674   : > { %3571 = vmatprep.mubr.msk.bf16.mxu1 %vm1848_vm6, %v2028_v25  ;;  %v1839_v25 = vadd.f32 %v3550_v24, %v3332_v21 }
 0x676   : > { %v1847_v27 = vpack.c.bf16 %v1839_v25, %v1836_v22 }
 0x677   : > { %v2030_v34 = vpop.permute.xlu1 %2029 }
 0x683   : > { %v2034_v26 = vpop.permute.xlu0 %2033 }
 0x684   : > { %v2044_v29 = vsel %vm1848_vm6, %v2034_v26, 0  ;;  %3666 = vmatprep.subr.msk.bf16.mxu1 %vm1848_vm6, %v2034_v26 }
 0x685   : > { %3568 = vmatpush3.bf16.xpose.msra.mxu1 %v2044_v29 }
 0x687   : > { %v2036_v30 = vpop.permute.xlu0 %2035 }
 0x688   : > { %3667 = vmatprep.subr.msk.bf16.mxu1 %vm1848_vm6, %v2036_v30  ;;  %v2047_v33 = vsel %vm1848_vm6, %v2036_v30, 0 }
 0x68d   : > { %3570 = vmatpush3.bf16.xpose.msra.mxu1 %v2047_v33 }
 0x694   : > { %3572 = vmatmul.mubr.msk.bf16.vlgmr.msra.gmra.mrb[12].mxu1 %vm1848_vm6, %v2030_v34 }
 0x6f4   : > { %v3557_v35 = vpop.f32.mrb[8].mxu1 }
 0x6f5   : > { %v1895_v36 = vpop.f32.mrb[9].mxu1  ;;  %v1912_v38 = vmul.f32 0.17677669, %v3557_v35  ;;  %v1828_v35 = vadd.f32 %v3332_v21, %v1827_v23 }
 0x6f6   : > { %v1910_v39 = vmul.f32 0.17677669, %v1895_v36  ;;  %v3558_v40 = vpop.f32.mrb[10].mxu1  ;;  %v1830_v36 = vpop.f32.mrb[3].mxu0 }
 0x6f7   : > { %v1898_v41 = vpop.f32.mrb[11].mxu1  ;;  %v1913_v44 = vmul.f32 0.17677669, %v3558_v40  ;;  %v1922_v47 = vadd.f32 %v3341_v37, %v1912_v38 }
 0x6f8   : > { %v1911_v42 = vmul.f32 0.17677669, %v1898_v41  ;;  %v1920_v43 = vadd.f32 %v3341_v37, %v1910_v39 }
 0x6f9   : > { %v1930_v49 = vsel %vm1848_vm6, %v1922_v47, -inf  ;;  %v1923_v50 = vadd.f32 %v3341_v37, %v1913_v44 }
 0x6fa   : > { %v1924_v45 = vsel %vm1848_vm6, %v1920_v43, -inf  ;;  %v1921_v46 = vadd.f32 %v3341_v37, %v1911_v42 }
 0x6fb   : > { %1925 = vmax.xlane.f32.xlu0 %v1924_v45  ;;  %v1933_v51 = vsel %vm1848_vm6, %v1923_v50, -inf }
 0x6fc   : > { %v1927_v48 = vsel %vm1848_vm6, %v1921_v46, -inf }
 0x6fd   : > { %1928 = vmax.xlane.f32.xlu1 %v1927_v48 }
 0x6ff   : > { %1931 = vmax.xlane.f32.xlu0 %v1930_v49 }
 0x703   : > { %1934 = vmax.xlane.f32.xlu0 %v1933_v51 }
 0x767   : > { %v3573_v52 = vpop.f32.mrb[12].mxu1 }
 0x768   : > { %v2083_v53 = vpop.f32.mrb[13].mxu1  ;;  %v2100_v56 = vmul.f32 0.17677669, %v3573_v52 }
 0x769   : > { %v2098_v57 = vmul.f32 0.17677669, %v2083_v53  ;;  %v3574_v60 = vpop.f32.mrb[14].mxu1 }
 0x76a   : > { %v2086_v61 = vpop.f32.mrb[15].mxu1  ;;  %v2101_v62 = vmul.f32 0.17677669, %v3574_v60  ;;  %v2104_v3 = vadd.f32 %v3341_v37, %v2100_v56 }
 0x76b   : > { %v2099_v63 = vmul.f32 0.17677669, %v2086_v61  ;;  %v2102_v0 = vadd.f32 %v3341_v37, %v2098_v57 }
 0x76c   : > { %v2105_v5 = vadd.f32 %v3341_v37, %v2101_v62  ;;  %v2112_v6 = vsel %vm1848_vm6, %v2104_v3, -inf }
 0x76d   : > { %v2106_v1 = vsel %vm1848_vm6, %v2102_v0, -inf  ;;  %v4842_v2 = vadd.f32 %v3341_v37, %v2099_v63  ;;  %v1831_v37 = vadd.f32 %v3332_v21, %v1830_v36  ;;  %v3868_v36 = vld [vmem:[%s4684_s19 + $0x18] sm:$0xff]  }
 0x76e   : > { %2107 = vmax.xlane.f32.xlu1 %v2106_v1  ;;  %v2115_v7 = vsel %vm1848_vm6, %v2105_v5, -inf }
 0x76f   : > { %v2109_v4 = vsel %vm1848_vm6, %v4842_v2, -inf  ;;  %v1846_v38 = vpack.c.bf16 %v1831_v37, %v1828_v35  ;;  %v3867_v35 = vld [vmem:[%s4684_s19 + $0x10] sm:$0xff]  }
 0x770   : > { %2110 = vmax.xlane.f32.xlu0 %v2109_v4 }
 0x771   : > { %3559 = vmatprep.subr.bf16.mxu0 %v1846_v38 }
 0x772   : > { %2113 = vmax.xlane.f32.xlu1 %v2112_v6  ;;  %3560 = vmatpush3.bf16.msra.mxu0 %v1846_v38 }
 0x773   : > { %3561 = vmatprep.subr.bf16.mxu0 %v1847_v27 }
 0x774   : > { %2116 = vmax.xlane.f32.xlu0 %v2115_v7 }
 0x776   : > { %3562 = vmatpush3.bf16.msra.mxu0 %v1847_v27 }
 0x788   : > { %v1926_v8 = vpop.xlane.xlu0 %1925 }
 0x789   : > { %v1936_v9 = vsub.f32 %v1920_v43, %v1926_v8 }
 0x78a   : > { %v1929_v10 = vpop.xlane.xlu1 %1928 }
 0x78b   : > { %v1940_v13 = vmul.f32 1.442695, %v1936_v9  ;;  %v1937_v14 = vsub.f32 %v1921_v46, %v1929_v10 }
 0x78c   : > { %v1932_v11 = vpop.xlane.xlu0 %1931 }
 0x78d   : > { %v1938_v12 = vsub.f32 %v1922_v47, %v1932_v11  ;;  %v1942_v18 = vmul.f32 1.442695, %v1937_v14 }
 0x78f   : > { %v1944_v15 = vmul.f32 1.442695, %v1938_v12 }
 0x790   : > { %v1935_v16 = vpop.xlane.xlu0 %1934 }
 0x791   : > { %3881 = vpow2.f32 %v1944_v15  ;;  %v1939_v17 = vsub.f32 %v1923_v50, %v1935_v16 }
 0x792   : > { %3883 = vpow2.f32 %v1940_v13 }
 0x793   : > { %v1946_v19 = vmul.f32 1.442695, %v1939_v17 }
 0x795   : > { %3885 = vpow2.f32 %v1946_v19 }
 0x796   : > { %3887 = vpow2.f32 %v1942_v18 }
 0x79b   : > { %v4849_v26 = vpop.eup %3881 }
 0x79c   : > { %v1954_v28 = vsel %vm1848_vm6, %v4849_v26, 0.0  ;;  %v3884_v29 = vpop.eup %3883 }
 0x79d   : > { %1955 = vadd.xlane.f32.xlu1 %v1954_v28  ;;  %v1948_v32 = vsel %vm1848_vm6, %v3884_v29, 0.0 }
 0x79f   : > { %v3886_v30 = vpop.eup %3885 }
 0x7a0   : > { %v1957_v31 = vsel %vm1848_vm6, %v3886_v30, 0.0  ;;  %v3888_v33 = vpop.eup %3887 }
 0x7a1   : > { %1958 = vadd.xlane.f32.xlu0 %v1957_v31  ;;  %1949 = vadd.xlane.f32.xlu1 %v1948_v32  ;;  %v1951_v34 = vsel %vm1848_vm6, %v3888_v33, 0.0 }
 0x7a5   : > { %1952 = vadd.xlane.f32.xlu0 %v1951_v34 }
 0x7fb   : > { %v2108_v39 = vpop.xlane.xlu1 %2107 }
 0x7fc   : > { %v2118_v40 = vsub.f32 %v2102_v0, %v2108_v39 }
 0x7fd   : > { %v2111_v41 = vpop.xlane.xlu0 %2110 }
 0x7fe   : > { %v2119_v43 = vsub.f32 %v4842_v2, %v2111_v41  ;;  %v2122_v45 = vmul.f32 1.442695, %v2118_v40 }
 0x7ff   : > { %v2114_v42 = vpop.xlane.xlu1 %2113 }
 0x800   : > { %v2120_v44 = vsub.f32 %v2104_v3, %v2114_v42  ;;  %v2124_v49 = vmul.f32 1.442695, %v2119_v43 }
 0x801   : > { %v2117_v46 = vpop.xlane.xlu0 %2116 }
 0x802   : > { %v2126_v47 = vmul.f32 1.442695, %v2120_v44  ;;  %v2121_v48 = vsub.f32 %v2105_v5, %v2117_v46 }
 0x804   : > { %3889 = vpow2.f32 %v2126_v47  ;;  %v2128_v50 = vmul.f32 1.442695, %v2121_v48 }
 0x805   : > { %3891 = vpow2.f32 %v2122_v45 }
 0x806   : > { %3893 = vpow2.f32 %v2128_v50 }
 0x807   : > { %3895 = vpow2.f32 %v2124_v49 }
 0x80e   : > { %v3890_v51 = vpop.eup %3889 }
 0x80f   : > { %v3892_v52 = vpop.eup %3891  ;;  %v2136_v53 = vsel %vm1848_vm6, %v3890_v51, 0.0 }
 0x810   : > { %v3894_v56 = vpop.eup %3893  ;;  %2137 = vadd.xlane.f32.xlu1 %v2136_v53  ;;  %v2130_v61 = vsel %vm1848_vm6, %v3892_v52, 0.0 }
 0x811   : > { %v2139_v57 = vsel %vm1848_vm6, %v3894_v56, 0.0  ;;  %v3896_v60 = vpop.eup %3895 }
 0x812   : > { %2140 = vadd.xlane.f32.xlu0 %v2139_v57  ;;  %v2133_v62 = vsel %vm1848_vm6, %v3896_v60, 0.0  ;;  %v3348_v57 = vld [vmem:[%s5186_s14] ss:$0 sm:$0xff] }
 0x814   : > { %2131 = vadd.xlane.f32.xlu1 %v2130_v61 }
 0x816   : > { %2134 = vadd.xlane.f32.xlu0 %v2133_v62 }
 0x825   : > { %2154 = vrot.lane.b32.xlu1 %v1846_v38, %s4236_s11 }
 0x82a   : > { %v1956_v63 = vpop.xlane.xlu1 %1955 }
 0x82c   : > { %2156 = vrot.lane.b32.xlu0 %v1847_v27, %s4236_s11 }
 0x82e   : > { %v1959_v0 = vpop.xlane.xlu0 %1958  ;;  %v1950_v1 = vpop.xlane.xlu1 %1949 }
 0x82f   : > { %3897 = vrcp.f32 %v1959_v0 }
 0x830   : > { %3899 = vrcp.f32 %v1950_v1 }
 0x831   : > { %3901 = vrcp.f32 %v1956_v63 }
 0x832   : > { %v1953_v2 = vpop.xlane.xlu0 %1952 }
 0x833   : > { %3903 = vrcp.f32 %v1953_v2 }
 0x839   : > { %v3898_v3 = vpop.eup %3897 }
 0x83a   : > { %v3900_v4 = vpop.eup %3899  ;;  %v1967_v7 = vmul.f32 %v3898_v3, %v3886_v30  ;;  %v3866_v30 = vld [vmem:[%s4684_s19 + $0x8] sm:$0xff]  }
 0x83b   : > { %v3902_v5 = vpop.eup %3901  ;;  %v1961_v8 = vmul.f32 %v3900_v4, %v3884_v29  ;;  %v3865_v29 = vld [vmem:[%s4684_s19] sm:$0xff]  }
 0x83c   : > { %v1965_v10 = vmul.f32 %v3902_v5, %v4849_v26 }
 0x83d   : > { %v3904_v6 = vpop.eup %3903 }
 0x83e   : > { %v1963_v9 = vmul.f32 %v3904_v6, %v3888_v33  ;;  %v1969_v12 = vpack.c.bf16 %v1967_v7, %v1965_v10 }
 0x840   : > { %v1968_v11 = vpack.c.bf16 %v1963_v9, %v1961_v8 }
 0x842   : > { %3563 = vmatprep.mubr.msk.bf16.mxu0 %vm1848_vm6, %v1968_v11 }
 0x843   : > { %3564 = vmatmul.mubr.msk.bf16.vlgmr.msra.gmra.mrb[4].mxu0 %vm1848_vm6, %v1969_v12 }
 0x89d   : > { %v2138_v13 = vpop.xlane.xlu1 %2137 }
 0x89f   : > { %v2141_v14 = vpop.xlane.xlu0 %2140 }
 0x8a0   : > { %3905 = vrcp.f32 %v2141_v14 }
 0x8a1   : > { %v2132_v15 = vpop.xlane.xlu1 %2131 }
 0x8a2   : > { %3907 = vrcp.f32 %v2132_v15 }
 0x8a3   : > { %3909 = vrcp.f32 %v2138_v13  ;;  %v2135_v16 = vpop.xlane.xlu0 %2134 }
 0x8a4   : > { %3911 = vrcp.f32 %v2135_v16 }
 0x8a5   : > { %v2155_v17 = vpop.permute.xlu1 %2154 }
 0x8a6   : > { %3575 = vmatprep.subr.bf16.mxu0 %v2155_v17 }
 0x8a7   : > { %v2157_v18 = vpop.permute.xlu0 %2156  ;;  %3576 = vmatpush3.bf16.msra.mxu0 %v2155_v17 }
 0x8a8   : > { %3577 = vmatprep.subr.bf16.mxu0 %v2157_v18 }
 0x8aa   : > { %v3906_v19 = vpop.eup %3905 }
 0x8ab   : > { %3578 = vmatpush3.bf16.msra.mxu0 %v2157_v18  ;;  %v2149_v23 = vmul.f32 %v3906_v19, %v3894_v56 }
 0x8ac   : > { %v3908_v20 = vpop.eup %3907  ;;  %3583 = vmatprep.subr.bf16.mxu0 %v3865_v29 }
 0x8ad   : > { %v3910_v21 = vpop.eup %3909  ;;  %v2143_v24 = vmul.f32 %v3908_v20, %v3892_v52 }
 0x8ae   : > { %v3912_v22 = vpop.eup %3911  ;;  %v2147_v26 = vmul.f32 %v3910_v21, %v3890_v51 }
 0x8af   : > { %v2145_v25 = vmul.f32 %v3912_v22, %v3896_v60 }
 0x8b0   : > { %v2151_v28 = vpack.c.bf16 %v2149_v23, %v2147_v26 }
 0x8b1   : > { %v2150_v27 = vpack.c.bf16 %v2145_v25, %v2143_v24 }
 0x8b3   : > { %3579 = vmatprep.mubr.msk.bf16.mxu0 %vm1848_vm6, %v2150_v27 }
 0x8b4   : > { %3580 = vmatmul.mubr.msk.bf16.vlgmr.msra.gmra.mrb[8].mxu0 %vm1848_vm6, %v2151_v28  ;;  %v3869_v28 = vld [vmem:[%s4706_s0] sm:$0xff]  }
 0x8b5   : > { %3584 = vmatpush3.bf16.msra.mxu0 %v3865_v29  ;;  %3595 = vmatprep.subr.bf16.mxu1 %v3869_v28  ;;  %v3870_v29 = vld [vmem:[%s4706_s0 + $0x8] sm:$0xff]  }
 0x8b6   : > { %3585 = vmatprep.subr.bf16.mxu0 %v3866_v30  ;;  %3596 = vmatpush3.bf16.msra.mxu1 %v3869_v28 }
 0x8b7   : > { %3597 = vmatprep.subr.bf16.mxu1 %v3870_v29 }
 0x8b9   : > { %3586 = vmatpush3.bf16.msra.mxu0 %v3866_v30  ;;  %v3871_v30 = vld [vmem:[%s4706_s0 + $0x10] sm:$0xff]  }
 0x8ba   : > { %3587 = vmatprep.subr.bf16.mxu0 %v3867_v35  ;;  %3598 = vmatpush3.bf16.msra.mxu1 %v3870_v29 }
 0x8bb   : > { %3599 = vmatprep.subr.bf16.mxu1 %v3871_v30 }
 0x8bd   : > { %3588 = vmatpush3.bf16.msra.mxu0 %v3867_v35 }
 0x8be   : > { %3589 = vmatprep.subr.bf16.mxu0 %v3868_v36  ;;  %3600 = vmatpush3.bf16.msra.mxu1 %v3871_v30 }
 0x8c1   : > { %3590 = vmatpush3.bf16.msra.mxu0 %v3868_v36 }
 0x916   : > { %v3565_v31 = vpop.f32.mrb[4].mxu0 }
 0x917   : > { %v2010_v32 = vpop.f32.mrb[5].mxu0 }
 0x918   : > { %v3566_v33 = vpop.f32.mrb[6].mxu0 }
 0x919   : > { %v2013_v34 = vpop.f32.mrb[7].mxu0 }
 0x987   : > { %v3581_v37 = vpop.f32.mrb[8].mxu0 }
 0x988   : > { %v2200_v38 = vpop.f32.mrb[9].mxu0 }
 0x989   : > { %v3582_v39 = vpop.f32.mrb[10].mxu0 }
 0x98a   : > { %v3848_v40 = vpack.i.bf16 %v3582_v39, %v3581_v37  ;;  %v2203_v41 = vpop.f32.mrb[11].mxu0 }
 0x98b   : > { %v3843_v42 = vpack.i.bf16 %v2203_v41, %v2200_v38 }
 0x98d   : > { %3844 = vrot.lane.b32.xlu1 %v3843_v42, %s4237_s29 }
 0x991   : > { %3849 = vrot.lane.b32.xlu1 %v3848_v40, %s4237_s29 }
 0x9ff   : > { %v3845_v43 = vpop.permute.xlu1 %3844 }
 0xa00   : > { %v3847_v44 = vunpack.i.h.bf16 %v3845_v43  ;;  %v3846_v45 = vunpack.i.l.bf16 %v3845_v43 }
 0xa02   : > { %v2232_v46 = vsel %vm1848_vm6, %v2013_v34, %v3847_v44  ;;  %v2231_v47 = vsel %vm1848_vm6, %v2010_v32, %v3846_v45  ;;  %v3355_v45 = vld [vmem:[%s5188_s24] ss:$0 sm:$0xff] }
 0xa03   : > { %v2235_v48 = vpack.c.bf16 %v2232_v46, %v2231_v47  ;;  %v3850_v49 = vpop.permute.xlu1 %3849 }
 0xa04   : > { %v3852_v50 = vunpack.i.h.bf16 %v3850_v49  ;;  %v3851_v51 = vunpack.i.l.bf16 %v3850_v49 }
 0xa05   : > { %3591 = vmatprep.mubr.msk.bf16.mxu0 %vm1606_vm5, %v2235_v48 }
 0xa06   : > { %v2234_v52 = vsel %vm1848_vm6, %v3566_v33, %v3852_v50  ;;  %v2233_v53 = vsel %vm1848_vm6, %v3565_v31, %v3851_v51  ;;  %v3872_v31 = vld [vmem:[%s4706_s0 + $0x18] sm:$0xff]   ;;  %v3356_v51 = vld [vmem:[%s5190_s7] ss:$0 sm:$0xff]  ;;  %s5198_s7 = sld [smem:[#allocation56_spill]] (!%p3375_p3) }
 0xa07   : > { %v2236_v56 = vpack.c.bf16 %v2234_v52, %v2233_v53  ;;  %3601 = vmatprep.subr.bf16.mxu1 %v3872_v31 }
 0xa08   : > { %3602 = vmatpush3.bf16.msra.mxu1 %v3872_v31 }
 0xa09   : > { %3592 = vmatmul.mubr.msk.bf16.vlgmr.msra.gmra.mrb[12].mxu0 %vm1606_vm5, %v2236_v56 }
 0xa0c   : > { %s5199_s9 = smov (!%p3375_p3), %s5198_s7 }
 0xadc   : > { %v3593_v60 = vpop.f32.mrb[12].mxu0 }
 0xadd   : > { %v2316_v61 = vpop.f32.mrb[13].mxu0  ;;  %v2325_v62 = vadd.f32 %v3593_v60, %v3348_v57 }
 0xade   : > { %v2317_v63 = vadd.f32 %v3348_v57, %v2316_v61  ;;  %v3594_v0 = vpop.f32.mrb[14].mxu0 }
 0xadf   : > { %v2319_v1 = vpop.f32.mrb[15].mxu0  ;;  %v2328_v4 = vadd.f32 %v3594_v0, %v3348_v57  ;;  %v2333_v7 = vadd.f32 %v2325_v62, %v4791_v58 }
 0xae0   : > { %v2320_v2 = vadd.f32 %v3348_v57, %v2319_v1  ;;  %v2331_v3 = vadd.f32 %v2317_v63, %v4782_v54 }
 0xae1   : > { %v2343_v9 = vsel %vm1606_vm5, %v2333_v7, 0.0  ;;  %v2334_v10 = vadd.f32 %v2328_v4, %v4793_v59  ;;  %v3873_v4 = vld [vmem:[%s4720_s6] sm:$0xff]  }
 0xae2   : > { %v2337_v5 = vsel %vm1606_vm5, %v2331_v3, 0.0  ;;  %v2332_v6 = vadd.f32 %v2320_v2, %v4784_v55  ;;  %3607 = vmatprep.subr.bf16.mxu0 %v3873_v4 }
 0xae3   : > { %2338 = vadd.xlane.f32.xlu0 %v2337_v5  ;;  %v2346_v11 = vsel %vm1606_vm5, %v2334_v10, 0.0  ;;  %3608 = vmatpush3.bf16.msra.mxu0 %v3873_v4  ;;  %v3874_v5 = vld [vmem:[%s4720_s6 + $0x8] sm:$0xff]  }
 0xae4   : > { %v2340_v8 = vsel %vm1606_vm5, %v2332_v6, 0.0  ;;  %3609 = vmatprep.subr.bf16.mxu0 %v3874_v5 }
 0xae5   : > { %2341 = vadd.xlane.f32.xlu1 %v2340_v8  ;;  %v3877_v8 = vld [vmem:[%s4720_s6 + $0x20] sm:$0xff]  }
 0xae7   : > { %2344 = vadd.xlane.f32.xlu0 %v2343_v9  ;;  %3610 = vmatpush3.bf16.msra.mxu0 %v3874_v5  ;;  %v3878_v9 = vld [vmem:[%s4720_s6 + $0x28] sm:$0xff]  }
 0xaeb   : > { %2347 = vadd.xlane.f32.xlu0 %v2346_v11  ;;  %v3880_v11 = vld [vmem:[%s4720_s6 + $0x38] sm:$0xff]  }
 0xb70   : > { %v2339_v54 = vpop.xlane.xlu0 %2338 }
 0xb71   : > { %v2350_v12 = vmul.f32 0.015625, %v2339_v54  ;;  %v3357_v54 = vld [vmem:[%s1094_s12] ss:$0 sm:$0xff] }
 0xb72   : > { %v2342_v13 = vpop.xlane.xlu1 %2341 }
 0xb73   : > { %v2354_v14 = vsub.f32 %v2331_v3, %v2350_v12  ;;  %v2351_v15 = vmul.f32 0.015625, %v2342_v13 }
 0xb74   : > { %v2345_v55 = vpop.xlane.xlu0 %2344 }
 0xb75   : > { %v2355_v16 = vsub.f32 %v2332_v6, %v2351_v15  ;;  %v2352_v58 = vmul.f32 0.015625, %v2345_v55  ;;  %v2358_v17 = vmul.f32 %v2354_v14, %v2354_v14  ;;  %v3875_v6 = vld [vmem:[%s4720_s6 + $0x10] sm:$0xff]  }
 0xb76   : > { %3611 = vmatprep.subr.bf16.mxu0 %v3875_v6 }
 0xb77   : > { %v2356_v18 = vsub.f32 %v2333_v7, %v2352_v58  ;;  %v2362_v19 = vsel %vm1606_vm5, %v2358_v17, 0.0  ;;  %v2359_v20 = vmul.f32 %v2355_v16, %v2355_v16  ;;  %3612 = vmatpush3.bf16.msra.mxu0 %v3875_v6  ;;  %v3876_v7 = vld [vmem:[%s4720_s6 + $0x18] sm:$0xff]  }
 0xb78   : > { %2363 = vadd.xlane.f32.xlu1 %v2362_v19  ;;  %v2348_v59 = vpop.xlane.xlu0 %2347  ;;  %3613 = vmatprep.subr.bf16.mxu0 %v3876_v7 }
 0xb79   : > { %v2353_v21 = vmul.f32 0.015625, %v2348_v59  ;;  %v2365_v22 = vsel %vm1606_vm5, %v2359_v20, 0.0  ;;  %v2360_v23 = vmul.f32 %v2356_v18, %v2356_v18 }
 0xb7a   : > { %2366 = vadd.xlane.f32.xlu0 %v2365_v22 }
 0xb7b   : > { %v2357_v24 = vsub.f32 %v2334_v10, %v2353_v21  ;;  %v2368_v25 = vsel %vm1606_vm5, %v2360_v23, 0.0  ;;  %3614 = vmatpush3.bf16.msra.mxu0 %v3876_v7  ;;  %v3879_v10 = vld [vmem:[%s4720_s6 + $0x30] sm:$0xff]  }
 0xb7c   : > { %2369 = vadd.xlane.f32.xlu1 %v2368_v25  ;;  %3615 = vmatprep.subr.bf16.mxu0 %v3877_v8 }
 0xb7d   : > { %v2361_v26 = vmul.f32 %v2357_v24, %v2357_v24 }
 0xb7f   : > { %v2371_v27 = vsel %vm1606_vm5, %v2361_v26, 0.0  ;;  %3616 = vmatpush3.bf16.msra.mxu0 %v3877_v8 }
 0xb80   : > { %2372 = vadd.xlane.f32.xlu0 %v2371_v27  ;;  %3617 = vmatprep.subr.bf16.mxu0 %v3878_v9 }
 0xb83   : > { %3618 = vmatpush3.bf16.msra.mxu0 %v3878_v9 }
 0xb84   : > { %3619 = vmatprep.subr.bf16.mxu0 %v3879_v10 }
 0xb87   : > { %3620 = vmatpush3.bf16.msra.mxu0 %v3879_v10 }
 0xb88   : > { %3621 = vmatprep.subr.bf16.mxu0 %v3880_v11 }
 0xb8b   : > { %3622 = vmatpush3.bf16.msra.mxu0 %v3880_v11 }
 0xc05   : > { %v2364_v32 = vpop.xlane.xlu1 %2363 }
 0xc06   : > { %v2374_v33 = vmul.f32 0.015625, %v2364_v32 }
 0xc07   : > { %v2367_v34 = vpop.xlane.xlu0 %2366 }
 0xc08   : > { %v2378_v35 = vadd.f32 1e-05, %v2374_v33  ;;  %v2375_v36 = vmul.f32 0.015625, %v2367_v34 }
 0xc09   : > { %v2370_v37 = vpop.xlane.xlu1 %2369 }
 0xc0a   : > { %3913 = vrsqrt.f32 %v2378_v35  ;;  %v2379_v38 = vadd.f32 1e-05, %v2375_v36  ;;  %v2376_v39 = vmul.f32 0.015625, %v2370_v37 }
 0xc0c   : > { %3915 = vrsqrt.f32 %v2379_v38  ;;  %v2380_v40 = vadd.f32 1e-05, %v2376_v39 }
 0xc0d   : > { %v2373_v41 = vpop.xlane.xlu0 %2372 }
 0xc0e   : > { %3917 = vrsqrt.f32 %v2380_v40  ;;  %v2377_v42 = vmul.f32 0.015625, %v2373_v41 }
 0xc10   : > { %v2381_v43 = vadd.f32 1e-05, %v2377_v42 }
 0xc12   : > { %3919 = vrsqrt.f32 %v2381_v43 }
 0xc14   : > { %v3914_v44 = vpop.eup %3913 }
 0xc15   : > { %v2386_v46 = vmul.f32 %v3914_v44, %v2354_v14 }
 0xc16   : > { %v3916_v47 = vpop.eup %3915 }
 0xc17   : > { %v2387_v48 = vmul.f32 %v3916_v47, %v2355_v16  ;;  %v2396_v49 = vmul.f32 %v3355_v45, %v2386_v46 }
 0xc18   : > { %v3918_v50 = vpop.eup %3917 }
 0xc19   : > { %v2388_v52 = vmul.f32 %v3918_v50, %v2356_v18  ;;  %v2397_v53 = vmul.f32 %v3355_v45, %v2387_v48  ;;  %v4909_v56 = vadd.f32 %v3356_v51, %v2396_v49 }
 0xc1b   : > { %v4911_v57 = vadd.f32 %v3356_v51, %v2397_v53  ;;  %v2398_v61 = vmul.f32 %v3355_v45, %v2388_v52 }
 0xc1c   : > { %v3920_v60 = vpop.eup %3919 }
 0xc1d   : > { %v2389_v62 = vmul.f32 %v3920_v60, %v2357_v24  ;;  %v2410_v63 = vpack.c.bf16 %v4911_v57, %v4909_v56  ;;  %v4916_v1 = vadd.f32 %v3356_v51, %v2398_v61  ;;  %v3364_v61 = vld [vmem:[%s1102_s25] ss:$0 sm:$0xff] }
 0xc1f   : > { %v2399_v0 = vmul.f32 %v3355_v45, %v2389_v62  ;;  %3603 = vmatprep.mubr.msk.bf16.mxu1 %vm1606_vm5, %v2410_v63 }
 0xc21   : > { %v4918_v2 = vadd.f32 %v3356_v51, %v2399_v0 }
 0xc23   : > { %v2411_v3 = vpack.c.bf16 %v4918_v2, %v4916_v1 }
 0xc25   : > { %3604 = vmatmul.mubr.msk.bf16.vlgmr.msra.gmra.mrb[16].mxu1 %vm1606_vm5, %v2411_v3 }
 0xcf8   : > { %v3605_v12 = vpop.f32.mrb[16].mxu1 }
 0xcf9   : > { %v2500_v13 = vadd.f32 %v3605_v12, %v3357_v54  ;;  %v2491_v14 = vpop.f32.mrb[17].mxu1 }
 0xcfa   : > { %v2492_v15 = vadd.f32 %v3357_v54, %v2491_v14  ;;  %v3606_v55 = vpop.f32.mrb[18].mxu1 }
 0xcfb   : > { %v2512_v16 = vmul.f32 0.044715, %v2500_v13  ;;  %v2503_v58 = vadd.f32 %v3606_v55, %v3357_v54  ;;  %v2494_v17 = vpop.f32.mrb[19].mxu1  ;;  %v2508_v43 = vmul.f32 0.5, %v2500_v13 }
 0xcfc   : > { %v2510_v18 = vmul.f32 0.044715, %v2492_v15  ;;  %v2495_v19 = vadd.f32 %v3357_v54, %v2494_v17  ;;  %v2506_v46 = vmul.f32 0.5, %v2492_v15 }
 0xcfd   : > { %v2516_v20 = vmul.f32 %v2512_v16, %v2500_v13  ;;  %v2513_v59 = vmul.f32 0.044715, %v2503_v58  ;;  %v2509_v44 = vmul.f32 0.5, %v2503_v58 }
 0xcfe   : > { %v2514_v21 = vmul.f32 %v2510_v18, %v2492_v15  ;;  %v2511_v22 = vmul.f32 0.044715, %v2495_v19  ;;  %v2507_v47 = vmul.f32 0.5, %v2495_v19 }
 0xcff   : > { %v2520_v23 = vmul.f32 %v2516_v20, %v2500_v13  ;;  %v2517_v24 = vmul.f32 %v2513_v59, %v2503_v58 }
 0xd00   : > { %v2518_v25 = vmul.f32 %v2514_v21, %v2492_v15  ;;  %v2515_v26 = vmul.f32 %v2511_v22, %v2495_v19 }
 0xd01   : > { %v2524_v27 = vadd.f32 %v2520_v23, %v2500_v13  ;;  %v2521_v28 = vmul.f32 %v2517_v24, %v2503_v58 }
 0xd02   : > { %v2519_v29 = vmul.f32 %v2515_v26, %v2495_v19  ;;  %v2522_v30 = vadd.f32 %v2518_v25, %v2492_v15 }
 0xd03   : > { %v2528_v31 = vmul.f32 0.7978846, %v2524_v27  ;;  %v2525_v32 = vadd.f32 %v2521_v28, %v2503_v58 }
 0xd04   : > { %v2523_v33 = vadd.f32 %v2519_v29, %v2495_v19  ;;  %v2526_v34 = vmul.f32 0.7978846, %v2522_v30 }
 0xd05   : > { %3921 = vtanh.f32 %v2528_v31  ;;  %v2529_v35 = vmul.f32 0.7978846, %v2525_v32 }
 0xd06   : > { %v2527_v36 = vmul.f32 0.7978846, %v2523_v33  ;;  %3923 = vtanh.f32 %v2526_v34 }
 0xd07   : > { %3925 = vtanh.f32 %v2529_v35 }
 0xd08   : > { %3927 = vtanh.f32 %v2527_v36 }
 0xd0f   : > { %v3922_v37 = vpop.eup %3921 }
 0xd10   : > { %v3924_v38 = vpop.eup %3923  ;;  %v2536_v39 = vadd.f32 1.0, %v3922_v37 }
 0xd11   : > { %v3926_v40 = vpop.eup %3925  ;;  %v2534_v41 = vadd.f32 1.0, %v3924_v38 }
 0xd12   : > { %v3928_v42 = vpop.eup %3927  ;;  %v2537_v45 = vadd.f32 1.0, %v3926_v40  ;;  %v2540_v49 = vmul.f32 %v2536_v39, %v2508_v43 }
 0xd13   : > { %v2535_v48 = vadd.f32 1.0, %v3928_v42  ;;  %v2538_v51 = vmul.f32 %v2534_v41, %v2506_v46  ;;  %v3373_v41 = vld [vmem:[%s1105_s4] ss:$0 sm:$0xff]  ;;  %s5196_s4 = sld [smem:[#allocation54_spill]] (!%p3375_p3) }
 0xd14   : > { %v2541_v50 = vmul.f32 %v2537_v45, %v2509_v44  ;;  %v3374_v44 = vld [vmem:[%s1108_s27] ss:$0 sm:$0xff]  ;;  %s5195_s27 = scalar_lea.vmem (!%p3375_p3), [#allocation3], %s4635_s22 }
 0xd15   : > { %v2539_v52 = vmul.f32 %v2535_v48, %v2507_v47 }
 0xd16   : > { %v2543_v53 = vpack.c.bf16 %v2541_v50, %v2540_v49 }
 0xd17   : > { %v2542_v60 = vpack.c.bf16 %v2539_v52, %v2538_v51 }
 0xd19   : > { %3623 = vmatprep.mubr.bf16.mxu0 %v2542_v60  ;;  %s5197_s30 = smov (!%p3375_p3), %s5196_s4 }
 0xd1a   : > { %3624 = vmatmul.mubr.bf16.vlgmr.msra.gmra.mrb[16].mxu0 %v2543_v53 }
 0xded   : > { %v3625_v62 = vpop.f32.mrb[16].mxu0 }
 0xdee   : > { %v2649_v63 = vpop.f32.mrb[17].mxu0  ;;  %v2658_v0 = vadd.f32 %v3625_v62, %v3364_v61 }
 0xdef   : > { %v2650_v3 = vadd.f32 %v3364_v61, %v2649_v63  ;;  %v3626_v4 = vpop.f32.mrb[18].mxu0 }
 0xdf0   : > { %v2652_v5 = vpop.f32.mrb[19].mxu0  ;;  %v2661_v6 = vadd.f32 %v3626_v4, %v3364_v61  ;;  %v2666_v11 = vadd.f32 %v2658_v0, %v4916_v1 }
 0xdf1   : > { %v2653_v7 = vadd.f32 %v3364_v61, %v2652_v5  ;;  %v2664_v8 = vadd.f32 %v2650_v3, %v4909_v56  ;;  %v4238_v5 = vmov (!%p3375_p3), 0.0|0.0  }
 0xdf2   : > { %v2667_v12 = vadd.f32 %v2661_v6, %v4918_v2  ;;  %v2676_v13 = vsel %vm1606_vm5, %v2666_v11, 0.0  ;;  %3658 = vmatprep.subr.bf16.mxu0 (!%p3375_p3), %v4238_v5 }
 0xdf3   : > { %v2670_v9 = vsel %vm1606_vm5, %v2664_v8, 0.0  ;;  %v2665_v10 = vadd.f32 %v2653_v7, %v4911_v57 }
 0xdf4   : > { %2671 = vadd.xlane.f32.xlu1 %v2670_v9  ;;  %v2679_v14 = vsel %vm1606_vm5, %v2667_v12, 0.0  ;;  %v2754_v9 = vld [vmem:[%s5195_s27] sm:$0x1] (!%p3375_p3) }
 0xdf5   : > { %v2673_v54 = vsel %vm1606_vm5, %v2665_v10, 0.0 }
 0xdf6   : > { %2674 = vadd.xlane.f32.xlu0 %v2673_v54  ;;  %v3937_v54 = vld [vmem:[%s5196_s4] sm:$0xff] (!%p3375_p3)  }
 0xdf8   : > { %2677 = vadd.xlane.f32.xlu1 %v2676_v13  ;;  %v3939_v13 = vld [vmem:[%s5197_s30 + $0x10] sm:$0xff] (!%p3375_p3)  }
 0xdfa   : > { %2680 = vadd.xlane.f32.xlu0 %v2679_v14  ;;  %v3940_v14 = vld [vmem:[%s5197_s30 + $0x18] sm:$0xff] (!%p3375_p3)  }
 0xe81   : > { %v2672_v15 = vpop.xlane.xlu1 %2671 }
 0xe82   : > { %v2682_v56 = vmul.f32 0.015625, %v2672_v15  ;;  %v3941_v15 = vld [vmem:[%s5198_s7] sm:$0xff] (!%p3375_p3)  }
 0xe83   : > { %v2675_v55 = vpop.xlane.xlu0 %2674 }
 0xe84   : > { %v2686_v16 = vsub.f32 %v2664_v8, %v2682_v56  ;;  %v2683_v58 = vmul.f32 0.015625, %v2675_v55  ;;  %v4240_v8 = vmov (!%p3375_p3), 0.0  }
 0xe85   : > { %v2678_v57 = vpop.xlane.xlu1 %2677  ;;  %3635 = vmatprep.mubr.msk.f32.mxu0 (!%p3375_p3), %vm4239_vm7, %v4240_v8  ;;  %3638 = vmatprep.subr.bf16.mxu1 (!%p3375_p3), %v4240_v8 }
 0xe86   : > { %v2687_v17 = vsub.f32 %v2665_v10, %v2683_v58  ;;  %v2684_v1 = vmul.f32 0.015625, %v2678_v57  ;;  %v2690_v18 = vmul.f32 %v2686_v16, %v2686_v16  ;;  %v2756_v10 = vsel (!%p3375_p3), %vm2755_vm8, %v2754_v9, 0.0  ;;  %3646 = vmatprep.mubr.msk.bf16.mxu1 (!%p3375_p3), %vm4239_vm7, %v4240_v8  ;;  %3639 = vmatpush3.bf16.msra.mxu1 (!%p3375_p3), %v3937_v54 }
 0xe87   : > { %v2681_v19 = vpop.xlane.xlu0 %2680  ;;  %3640 = vmatprep.subr.bf16.mxu1 (!%p3375_p3), %v4240_v8 }
 0xe88   : > { %v2688_v20 = vsub.f32 %v2666_v11, %v2684_v1  ;;  %v2685_v59 = vmul.f32 0.015625, %v2681_v19  ;;  %v2694_v2 = vsel %vm1606_vm5, %v2690_v18, 0.0  ;;  %v2691_v21 = vmul.f32 %v2687_v17, %v2687_v17  ;;  %v3942_v18 = vld [vmem:[%s5199_s9 + $0x8] sm:$0xff] (!%p3375_p3)   ;;  %v2844_v19 = vld [vmem:[%s5200_s20] sm:$0x1] (!%p3375_p3) }
 0xe89   : > { %2695 = vadd.xlane.f32.xlu1 %v2694_v2 }
 0xe8a   : > { %v2689_v22 = vsub.f32 %v2667_v12, %v2685_v59  ;;  %v2697_v23 = vsel %vm1606_vm5, %v2691_v21, 0.0  ;;  %v2692_v24 = vmul.f32 %v2688_v20, %v2688_v20  ;;  %v3938_v12 = vld [vmem:[%s5197_s30 + $0x8] sm:$0xff] (!%p3375_p3)  }
 0xe8b   : > { %2698 = vadd.xlane.f32.xlu0 %v2697_v23  ;;  %3641 = vmatpush3.bf16.msra.mxu1 (!%p3375_p3), %v3938_v12 }
 0xe8c   : > { %v2700_v25 = vsel %vm1606_vm5, %v2692_v24, 0.0  ;;  %v2693_v26 = vmul.f32 %v2689_v22, %v2689_v22  ;;  %3642 = vmatprep.subr.bf16.mxu1 (!%p3375_p3), %v4240_v8 }
 0xe8d   : > { %2701 = vadd.xlane.f32.xlu1 %v2700_v25 }
 0xe8e   : > { %v2703_v27 = vsel %vm1606_vm5, %v2693_v26, 0.0 }
 0xe8f   : > { %2704 = vadd.xlane.f32.xlu0 %v2703_v27  ;;  %3643 = vmatpush3.bf16.msra.mxu1 (!%p3375_p3), %v3939_v13 }
 0xe90   : > { %3644 = vmatprep.subr.bf16.mxu1 (!%p3375_p3), %v4240_v8 }
 0xe93   : > { %2757 = vadd.xlane.f32.xlu0 (!%p3375_p3), %v2756_v10  ;;  %3645 = vmatpush3.bf16.msra.mxu1 (!%p3375_p3), %v3940_v14 }
 0xf16   : > { %v2696_v28 = vpop.xlane.xlu1 %2695 }
 0xf17   : > { %v2706_v29 = vmul.f32 0.015625, %v2696_v28 }
 0xf18   : > { %v2699_v30 = vpop.xlane.xlu0 %2698 }
 0xf19   : > { %v2710_v31 = vadd.f32 1e-05, %v2706_v29  ;;  %v2707_v32 = vmul.f32 0.015625, %v2699_v30 }
 0xf1a   : > { %v2702_v33 = vpop.xlane.xlu1 %2701 }
 0xf1b   : > { %3929 = vrsqrt.f32 %v2710_v31  ;;  %v2711_v34 = vadd.f32 1e-05, %v2707_v32  ;;  %v2708_v35 = vmul.f32 0.015625, %v2702_v33 }
 0xf1c   : > { %v2705_v36 = vpop.xlane.xlu0 %2704 }
 0xf1d   : > { %3931 = vrsqrt.f32 %v2711_v34  ;;  %v2712_v37 = vadd.f32 1e-05, %v2708_v35  ;;  %v2709_v38 = vmul.f32 0.015625, %v2705_v36 }
 0xf1f   : > { %3933 = vrsqrt.f32 %v2712_v37  ;;  %v2713_v39 = vadd.f32 1e-05, %v2709_v38 }
 0xf20   : > { %v2758_v56 = vpop.xlane.xlu0 (!%p3375_p3), %2757 }
 0xf21   : > { %3935 = vrsqrt.f32 %v2713_v39  ;;  %v2759_v55 = vmax.f32 (!%p3375_p3), %v2758_v56, 1.0 }
 0xf23   : > { %3943 = vrcp.f32 (!%p3375_p3), %v2759_v55 }
 0xf25   : > { %v3930_v40 = vpop.eup %3929 }
 0xf26   : > { %v2718_v42 = vmul.f32 %v3930_v40, %v2686_v16 }
 0xf27   : > { %v3932_v43 = vpop.eup %3931 }
 0xf28   : > { %v2728_v45 = vmul.f32 %v3373_v41, %v2718_v42  ;;  %v2719_v46 = vmul.f32 %v3932_v43, %v2687_v17 }
 0xf29   : > { %v3934_v47 = vpop.eup %3933 }
 0xf2a   : > { %v2738_v48 = vadd.f32 %v3374_v44, %v2728_v45  ;;  %v2729_v49 = vmul.f32 %v3373_v41, %v2719_v46  ;;  %v2720_v50 = vmul.f32 %v3934_v47, %v2688_v20 }
 0xf2b   : > { %v3936_v51 = vpop.eup %3935 }
 0xf2c   : > { %2742 = vst.msk [vmem:[#allocation2] sm:$0xff] %vm1606_vm5, %v2738_v48  ;;  %v2739_v52 = vadd.f32 %v3374_v44, %v2729_v49  ;;  %v2730_v53 = vmul.f32 %v3373_v41, %v2720_v50  ;;  %v2721_v60 = vmul.f32 %v3936_v51, %v2689_v22  ;;  %2749 = sbr.rel (%p3375_p3) target bundleno = 4550 (0x11c6), region = 156 }
 0xf2d   : > { %v3944_v16 = vpop.eup (!%p3375_p3), %3943 }
 0xf2e   : > { %2743 = vst.msk [vmem:[#allocation2 + $0x8] sm:$0xff] %vm1606_vm5, %v2739_v52  ;;  %v2740_v61 = vadd.f32 %v3374_v44, %v2730_v53  ;;  %v2731_v62 = vmul.f32 %v3373_v41, %v2721_v60 }
 0xf30   : > { %2744 = vst.msk [vmem:[#allocation2 + $0x10] sm:$0xff] %vm1606_vm5, %v2740_v61  ;;  %v2741_v63 = vadd.f32 %v3374_v44, %v2731_v62 }
 0xf32   : > { %2745 = vst.msk [vmem:[#allocation2 + $0x18] sm:$0xff] %vm1606_vm5, %v2741_v63 }
 0xf33   : > { %v2750_v0 = vld [vmem:[#allocation2] sm:$0xff] }
 0xf35   : > { %v2751_v3 = vld [vmem:[#allocation2 + $0x8] sm:$0xff] }
 0xf36   : > { %v3659_v6 = vpack.c.bf16 %v2751_v3, %v2750_v0 }
 0xf37   : > { %v2752_v4 = vld [vmem:[#allocation2 + $0x10] sm:$0xff] }
 0xf38   : > { %3660 = vmatpush3.bf16.msra.mxu0 %v3659_v6 }
 0xf39   : > { %v2753_v7 = vld [vmem:[#allocation2 + $0x18] sm:$0xff]  ;;  %3661 = vmatprep.subr.bf16.mxu0 %v4238_v5 }
 0xf3a   : > { %v3662_v11 = vpack.c.bf16 %v2753_v7, %v2752_v4 }
 0xf3c   : > { %3663 = vmatpush3.bf16.msra.mxu0 %v3662_v11 }
 0xf3d   : > { %3650 = vmatprep.subr.bf16.mxu0 %v4240_v8 }
 0xf3f   : > { %3636 = vmatmul.mubr.msk.f32.vlgmr.msra.gmra.mrb[0].mxu0 %vm1848_vm6, %v2754_v9 }
 0xf40   : > { %3654 = vmatprep.mubr.msk.bf16.mxu0 %vm4239_vm7, %v4240_v8  ;;  %3651 = vmatpush3.bf16.msra.mxu0 %v3941_v15 }
 0xf41   : > { %3652 = vmatprep.subr.bf16.mxu0 %v4240_v8 }
 0xf44   : > { %3653 = vmatpush3.bf16.msra.mxu0 %v3942_v18 }
0x1012   : > { %v2829_v58 = vpop.f32.mrb[0].mxu0 }
0x1013   : > { %v2834_v57 = vmul.f32 %v3944_v16, %v2829_v58  ;;  %v3637_v17 = vpop.f32.mrb[1].mxu0 }
0x1015   : > { %v2835_v1 = vpack.c.bf16 %v2834_v57, %v2834_v57 }
0x1017   : > { %3647 = vmatmul.mubr.msk.bf16.vlgmr.msra.gmra.mrb[0].mxu1 %vm1606_vm5, %v2835_v1 }
0x10ea   : > { %v2906_v20 = vpop.f32.mrb[0].mxu1 }
0x10eb   : > { %v2907_v59 = vadd.f32 %v2906_v20, %v2844_v19  ;;  %v3648_v2 = vpop.f32.mrb[1].mxu1 }
0x10ec   : > { %v2909_v21 = vpop.f32.mrb[2].mxu1 }
0x10ed   : > { %v2912_v22 = vpack.c.bf16 %v2907_v59, %v2907_v59  ;;  %v3649_v23 = vpop.f32.mrb[3].mxu1 }
0x10ef   : > { %3655 = vmatmul.mubr.msk.bf16.vlgmr.msra.gmra.mrb[4].mxu0 %vm1848_vm6, %v2912_v22 }
0x11c2   : > { %v2966_v24 = vpop.f32.mrb[4].mxu0 }
0x11c3   : > { %2973 = vst.msk [vmem:[%s1055_s21] sm:$0x1] %vm2972_vm9, %v2966_v24  ;;  %v3656_v25 = vpop.f32.mrb[5].mxu0 }
0x11c4   : > { %v2969_v26 = vpop.f32.mrb[6].mxu0 }
0x11c5   : > { %v3657_v27 = vpop.f32.mrb[7].mxu0 }
0x11c6 PF: > { %s5201_s25 = sld [smem:[#allocation28_spill]]  ;;  %s3385_s13 = sshll.u32 %s4213_s8, 4 }
0x11c7   : > { %s5202_s18 = sld [smem:[#allocation57_spill]]  ;;  %s2987_s27 = sshll.u32 %s1055_s21, 4  ;;  %s2988_s27 = int_to_ptr.vmem [resolvable:$true] %s2987_s27 }
0x11c8   : > { %s2975_s28 = scalar_lea.sflag [#allocation5], %s4635_s22  ;;  %s4115_s2 = scalar_lea.vmem %s2988_s27, 16 }
0x11c9   : > { %p4116_p8 = scmp.ne.s32.totalorder %s2988_s27, %s4115_s2  ;;  %s4241_s4 = smov [#allocation14]  }
0x11ca   : > { %s4119_s14 = sshll.u32 %s4241_s4, 4  ;;  %s4120_s14 = int_to_ptr.vmem [resolvable:$false] %s4119_s14 }
0x11cb   : > { %s4121_s0 = scalar_lea.vmem %s4120_s14, 32  ;;  %p4122_p5 = scmp.lt.s32.totalorder %s2988_s27, %s4120_s14 }
0x11cc   : > { %p5203_p9 = scmp.ne.s32.totalorder %s5201_s25, 0  ;;  %p4123_p12 = scmp.lt.s32.totalorder %s4121_s0, %s4115_s2 }
0x11cd   : > { %s5000_s19 = scalar_lea.hbm %s5202_s18, %s3385_s13 }
0x11ce   : > { %p4117_p10 = pnand %p4116_p8, %p5203_p9  ;;  %p4124_p13 = por %p4123_p12, %p4122_p5 }
0x11d0   : > { %p4118_p1 = pneg %p4117_p10 }
0x11d2   : > { %p4125_p2 = pnand %p4124_p13, %p4118_p1 }
0x11d4   : > { %4128 = shalt.err (!%p4125_p2)
}
0x11d5   : > { %s4129_s8 = scalar_lea.hbm %s5000_s19, 16  ;;  %s4133_s10 = scalar_lea.hbm %s5202_s18, 32 }
0x11d6   : > { %p4130_p11 = scmp.ne.s32.totalorder %s5000_s19, %s4129_s8  ;;  %p4134_p6 = scmp.lt.u32.totalorder %s5000_s19, %s5202_s18 }
0x11d7   : > { %p4135_p7 = scmp.lt.u32.totalorder %s4133_s10, %s4129_s8  ;;  %p4137_p8 = scmp.lt.u32.totalorder %s4129_s8, %s5000_s19 }
0x11d8   : > { %p4131_p4 = pnand %p4130_p11, %p5203_p9 }
0x11d9   : > { %p4136_p3 = por %p4135_p7, %p4134_p6 }
0x11da   : > { %p4132_p0 = pneg %p4131_p4 }
0x11db   : > { %p4138_p10 = por %p4137_p8, %p4136_p3 }
0x11dd   : > { %p4139_p1 = pnand %p4138_p10, %p4132_p0 }
0x11df   : > { %4142 = shalt.err (!%p4139_p1)
}
0x11e0   : > { %3692 = dma.vmem_to_hbm [thread:$0]  (%p5203_p9), %s2988_s27, 16, %s5000_s19, %s2975_s28  }
0x11e1 PF: > { %s5204_s16 = sld [smem:[#allocation25_spill]]  ;;  %s5205_s26 = sld [smem:[#allocation20_spill]] }
0x11e2   : > { %s5206_s3 = sld [smem:[#allocation29_spill]] }
0x11e7   : > { %p3729_p5 = scmp.ge.s32.totalorder %s5204_s16, 2  ;;  %s2999_s7 = sand.u32 1, %s5205_s26  }
0x11e8   : > { %p5207_p12 = scmp.ne.s32.totalorder %s5206_s3, 0  ;;  %s3000_s11 = scalar_lea.sflag [#allocation5], %s2999_s7 }
0x11ea   : > { %p3715_p13 = pnand %p3729_p5, %p5207_p12 }
0x11ec   : > { %4192 = dma.done.wait (!%p3715_p13), %s3000_s11, 16  }
0x11ed   : > { %4194 = vsyncadd (!%p3715_p13), %s3000_s11, 4294967280  ;;  %s45_s0 = sadd.s32 1, %s5204_s16   ;;  %s5208_s27 = sld [smem:[#allocation21_spill]] }
0x11ee   : > { %p42_p2 = scmp.ge.s32.totalorder %s45_s0, 6   ;;  %s5209_s3 = sld [smem:[#allocation22_spill]] }
0x11ef   : > { %s5210_s7 = sld [smem:[#allocation30_spill]]  ;;  %s5211_s28 = sld [smem:[#allocation23_spill]] }
0x11f0   : > { %s5212_s8 = sld [smem:[#allocation24_spill]]  ;;  %s5213_s4 = sld [smem:[#allocation26_spill]] }
0x11f1   : > { %s5214_s29 = sld [smem:[#allocation27_spill]]  ;;  %44 = sbr.rel (!%p42_p2) target bundleno = 38 (0x26), region = 243 }
0x11f8   :  { %3004 = vsyncpa [#allocation4], 1 }
0x11f9   :  { %3006 = vsyncpa [#allocation4 + $0x1], 1 }
0x11fa   :  { %3007 = vsyncpa [#allocation7], 1 }
0x11fb   :  { %3008 = vsyncpa [#allocation10], 1 }
0x11fc   :  { %3009 = vsyncpa [#allocation13], 1 }
0x11fd   :  { %3010 = vsyncpa [#allocation5], 1 }
0x11fe   :  { %3012 = vsyncpa [#allocation5 + $0x1], 1 }

</bundles_post_ra>
